<compile_context>
chip_gen: v7x
topology: tpu7x:2x2x1
jax: 0.10.0
libtpu: 0.0.40
codegen_flags: <defaults>
</compile_context>

<pallas_src>
import numpy as np
import jax
import jax.numpy as jnp
from jax.experimental import pallas as pl
from jax.experimental.pallas import tpu as pltpu

# ----- configuration (small, consistent with the module) --------------------
HEADS = 4
D = 32
D_K = D // HEADS
M = 4            # modality_num
MD = M * D       # 128 -> exactly one lane dimension
B = 2
EPS = 1e-5       # PyTorch LayerNorm default


# ----------------------------- Pallas kernel --------------------------------
def mmca_kernel(
    x_ref,
    wv_sa_ref, bv_sa_ref, g_sa_ref, be_sa_ref, wl_sa_ref, bl_sa_ref,
    wq_ref, bq_ref, wk_ref, bk_ref, wv_ref, bv_ref,
    gall_ref, rsum_ref, avg_ref,
    g_co_ref, be_co_ref, wl_co_ref, bl_co_ref,
    wf_ref, bf_ref,
    o_ref,
):
    f32 = jnp.float32
    x = x_ref[...]                      # (bb, 128) lane-dense, modality-major cols
    avg = avg_ref[...]                  # (128, 128) per-modality-chunk averaging

    def ln_chunks(y, gamma, beta):
        # LayerNorm over each modality's D-wide chunk, expressed with two
        # lane-dense matmuls against a block-averaging matrix (no reshapes,
        # no cross-lane reductions).
        mu = jnp.dot(y, avg, preferred_element_type=f32)
        d = y - mu
        var = jnp.dot(d * d, avg, preferred_element_type=f32)
        return d * jax.lax.rsqrt(var + EPS) * gamma + beta

    # ---- per-modality SelfAttention (seq len == 1 -> value path only), all
    # ---- modalities at once via block-diagonal (128,128) weights ------------
    v_sa = jnp.dot(x, wv_sa_ref[...], preferred_element_type=f32) + bv_sa_ref[...]
    o1 = ln_chunks(x + v_sa, g_sa_ref[...], be_sa_ref[...])
    l_sa = jnp.dot(o1, wl_sa_ref[...], preferred_element_type=f32) + bl_sa_ref[...]
    sa = ln_chunks(o1 + l_sa, g_sa_ref[...], be_sa_ref[...])            # (bb, 128)

    # ---- coattention q/k/v: shared (D,D) weights replicated block-diagonally;
    # ---- the 1/sqrt(d_k) scale was folded into wq/bq on the host ------------
    q = jnp.dot(sa, wq_ref[...], preferred_element_type=f32) + bq_ref[...]
    k = jnp.dot(sa, wk_ref[...], preferred_element_type=f32) + bk_ref[...]
    v = jnp.dot(sa, wv_ref[...], preferred_element_type=f32) + bv_ref[...]

    # ---- multi-head attention over the M modality tokens, vectorized over
    # ---- batch, heads and head-dim.  `gall` broadcasts modality j's K/V chunk
    # ---- (per head) to every modality position; `rsum` sums each
    # ---- (modality, head) group of D_K lanes.  Everything stays
    # ---- (bb,128)/(bb,512) lane-dense: no reshapes, no masked stores. -------
    kk = jnp.dot(k, gall_ref[...], preferred_element_type=f32)          # (bb, M*128)
    vv = jnp.dot(v, gall_ref[...], preferred_element_type=f32)          # (bb, M*128)
    rsum = rsum_ref[...]

    s_j = [jnp.dot(q * kk[:, j * MD:(j + 1) * MD], rsum,
                   preferred_element_type=f32) for j in range(M)]
    m_ = s_j[0]
    for j in range(1, M):
        m_ = jnp.maximum(m_, s_j[j])
    e_j = [jnp.exp(s - m_) for s in s_j]
    denom = e_j[0]
    for j in range(1, M):
        denom = denom + e_j[j]
    inv = pl.reciprocal(denom, approx=True)                             # EUP slot
    ctx = (e_j[0] * inv) * vv[:, 0:MD]
    for j in range(1, M):
        ctx = ctx + (e_j[j] * inv) * vv[:, j * MD:(j + 1) * MD]         # (bb, 128)

    # ---- AddNorm -> Linear -> AddNorm (shared LayerNorm), lane-dense --------
    n1 = ln_chunks(sa + ctx, g_co_ref[...], be_co_ref[...])
    lin = jnp.dot(n1, wl_co_ref[...], preferred_element_type=f32) + bl_co_ref[...]
    n2 = ln_chunks(n1 + lin, g_co_ref[...], be_co_ref[...])

    # ---- final Linear(M*D, D): the "flatten" is already our layout ----------
    o_ref[...] = jnp.dot(n2, wf_ref[...], preferred_element_type=f32) + bf_ref[...]


PARAM_ORDER = (
    "wv_sa_bd", "bv_sa", "g_sa", "be_sa", "wl_sa_bd", "bl_sa",
    "wq", "bq", "wk", "bk", "wv", "bv",
    "gall", "rsum", "avg",
    "g_co", "be_co", "wl_co", "bl_co", "wf", "bf",
)


def prepare_params(p):
    """One-time host-side transform of the module parameters into the
    lane-dense layout consumed by the kernel."""
    scale = 1.0 / float(D_K) ** 0.5
    eye_m = jnp.eye(M, dtype=jnp.float32)

    def block_diag(w):                   # (M, D, D) -> (MD, MD), per-modality blocks
        return jnp.einsum("mn,mij->minj", eye_m, w).reshape(MD, MD)

    def rep_diag(w):                     # (D, D) -> (MD, MD), same block per modality
        return jnp.kron(eye_m, w)

    col = np.arange(MD)
    mod = col // D                       # modality index of each flat column
    head = (col % D) // D_K              # head index
    dim = col % D_K                      # position within the head

    # gall[:, j*MD + c] = 1 selects modality j's (head, dim) element for every
    # destination column c with the same (head, dim).
    g_blocks = [((mod[:, None] == j)
                 & (head[:, None] == head[None, :])
                 & (dim[:, None] == dim[None, :])).astype(np.float32)
                for j in range(M)]
    gall = jnp.asarray(np.concatenate(g_blocks, axis=1))            # (MD, M*MD)

    # rsum sums (and broadcasts back) each contiguous group of D_K lanes,
    # i.e. one (modality, head) group.
    rsum = jnp.asarray((col[:, None] // D_K == col[None, :] // D_K)
                       .astype(np.float32))                         # (MD, MD)

    # avg averages (and broadcasts back) each modality's D-wide chunk; used for
    # the per-modality LayerNorm statistics.
    avg = jnp.asarray((col[:, None] // D == col[None, :] // D)
                      .astype(np.float32) / D)                      # (MD, MD)

    return {
        "wv_sa_bd": block_diag(p["wv_sa"]), "bv_sa": p["bv_sa"].reshape(1, MD),
        "g_sa": p["g_sa"].reshape(1, MD), "be_sa": p["be_sa"].reshape(1, MD),
        "wl_sa_bd": block_diag(p["wl_sa"]), "bl_sa": p["bl_sa"].reshape(1, MD),
        "wq": rep_diag(p["wq"] * scale), "bq": jnp.tile(p["bq"] * scale, (1, M)),
        "wk": rep_diag(p["wk"]), "bk": jnp.tile(p["bk"], (1, M)),
        "wv": rep_diag(p["wv"]), "bv": jnp.tile(p["bv"], (1, M)),
        "gall": gall, "rsum": rsum, "avg": avg,
        "g_co": jnp.tile(p["g_co"], (1, M)), "be_co": jnp.tile(p["be_co"], (1, M)),
        "wl_co": rep_diag(p["wl_co"]), "bl_co": jnp.tile(p["bl_co"], (1, M)),
        "wf": p["wf"], "bf": p["bf"],
    }


def multimodal_coattention(x, prepared, *, block_b=None):
    """x: (B, M, D) float32 -> (B, D) float32."""
    b, m_, d_ = x.shape
    assert (m_, d_) == (M, D)
    if block_b is None:
        block_b = b                      # single grid step: params DMA'd exactly once
    assert b % block_b == 0

    x_flat = x.reshape(b, MD)            # host-side reshape -> lane-dense input
    plist = [prepared[name] for name in PARAM_ORDER]

    def full_spec(a):
        nd = a.ndim
        return pl.BlockSpec(a.shape, lambda i, _nd=nd: (0,) * _nd)

    in_specs = [pl.BlockSpec((block_b, MD), lambda i: (i, 0))]
    in_specs += [full_spec(a) for a in plist]

    return pl.pallas_call(
        mmca_kernel,
        out_shape=jax.ShapeDtypeStruct((b, D), jnp.float32),
        grid=(b // block_b,),
        in_specs=in_specs,
        out_specs=pl.BlockSpec((block_b, D), lambda i: (i, 0)),
        compiler_params=pltpu.CompilerParams(
            dimension_semantics=("parallel",)),
    )(x_flat, *plist)


# ----- pure-JAX reference (for a sanity check) -------------------------------
def _ref_ln(x, gamma, beta):
    mu = jnp.mean(x, axis=-1, keepdims=True)
    var = jnp.mean((x - mu) ** 2, axis=-1, keepdims=True)
    return (x - mu) / jnp.sqrt(var + EPS) * gamma + beta


def reference_forward(x, p):
    b = x.shape[0]
    rows = []
    for m in range(M):
        xm = x[:, m, :]
        vm = xm @ p["wv_sa"][m] + p["bv_sa"][m]
        o1 = _ref_ln(xm + vm, p["g_sa"][m], p["be_sa"][m])
        lm = o1 @ p["wl_sa"][m] + p["bl_sa"][m]
        o2 = _ref_ln(o1 + lm, p["g_sa"][m], p["be_sa"][m])
        rows.append(o2)
    sa = jnp.stack(rows, axis=1)                    # (B, M, D)

    q = sa @ p["wq"] + p["bq"]
    k = sa @ p["wk"] + p["bk"]
    v = sa @ p["wv"] + p["bv"]

    def split(t):
        return t.reshape(b, M, HEADS, D_K).transpose(0, 2, 1, 3)

    qh, kh, vh = split(q), split(k), split(v)
    s = jnp.einsum("bhmd,bhnd->bhmn", qh, kh) / (float(D_K) ** 0.5)
    a = jax.nn.softmax(s, axis=-1)
    ctx = jnp.einsum("bhmn,bhnd->bhmd", a, vh).transpose(0, 2, 1, 3).reshape(b, M, D)

    n1 = _ref_ln(sa + ctx, p["g_co"], p["be_co"])
    lin = n1 @ p["wl_co"] + p["bl_co"]
    n2 = _ref_ln(n1 + lin, p["g_co"], p["be_co"])

    flat = n2.reshape(b, M * D)
    return flat @ p["wf"] + p["bf"]


def make_params(key):
    ks = jax.random.split(key, 20)

    def w(k, shape, scale=0.1):
        return (scale * jax.random.normal(k, shape)).astype(jnp.float32)

    return {
        # per-modality SelfAttention value/linear weights + shared-within-module LN
        "wv_sa": w(ks[0], (M, D, D)),
        "bv_sa": w(ks[1], (M, D)),
        "g_sa": (1.0 + 0.05 * jax.random.normal(ks[2], (M, D))).astype(jnp.float32),
        "be_sa": w(ks[3], (M, D), 0.05),
        "wl_sa": w(ks[4], (M, D, D)),
        "bl_sa": w(ks[5], (M, D)),
        # Coattention q/k/v linears
        "wq": w(ks[6], (D, D)), "bq": w(ks[7], (1, D)),
        "wk": w(ks[8], (D, D)), "bk": w(ks[9], (1, D)),
        "wv": w(ks[10], (D, D)), "bv": w(ks[11], (1, D)),
        # Coattention shared AddNorm + linear
        "g_co": (1.0 + 0.05 * jax.random.normal(ks[12], (1, D))).astype(jnp.float32),
        "be_co": w(ks[13], (1, D), 0.05),
        "wl_co": w(ks[14], (D, D)), "bl_co": w(ks[15], (1, D)),
        # final Linear(modality_num * d, d)
        "wf": w(ks[16], (M * D, D)), "bf": w(ks[17], (1, D)),
    }


if __name__ == "__main__":
    key = jax.random.PRNGKey(0)
    k_x, k_p = jax.random.split(key)
    x = jax.random.normal(k_x, (B, M, D), dtype=jnp.float32)
    params = make_params(k_p)

    prepared = prepare_params(params)       # one-time host-side weight transform
    out = jax.block_until_ready(multimodal_coattention(x, prepared))
    assert out.shape == (B, D)

    ref = jax.block_until_ready(reference_forward(x, params))
    if not jnp.allclose(out, ref, atol=2e-2, rtol=2e-2):
        raise AssertionError(
            f"mismatch: max abs err {jnp.max(jnp.abs(out - ref)):.2e}")

    print("KERNEL_OK")
</pallas_src>

<mosaic_0001>
module attributes {stable_mosaic.version = 11 : i64} {
  func.func @mmca_kernel(%arg0: i32, %arg1: memref<2x128xf32, #tpu.memory_space<vmem>>, %arg2: memref<128x128xf32, #tpu.memory_space<vmem>>, %arg3: memref<1x128xf32, #tpu.memory_space<vmem>>, %arg4: memref<1x128xf32, #tpu.memory_space<vmem>>, %arg5: memref<1x128xf32, #tpu.memory_space<vmem>>, %arg6: memref<128x128xf32, #tpu.memory_space<vmem>>, %arg7: memref<1x128xf32, #tpu.memory_space<vmem>>, %arg8: memref<128x128xf32, #tpu.memory_space<vmem>>, %arg9: memref<1x128xf32, #tpu.memory_space<vmem>>, %arg10: memref<128x128xf32, #tpu.memory_space<vmem>>, %arg11: memref<1x128xf32, #tpu.memory_space<vmem>>, %arg12: memref<128x128xf32, #tpu.memory_space<vmem>>, %arg13: memref<1x128xf32, #tpu.memory_space<vmem>>, %arg14: memref<128x512xf32, #tpu.memory_space<vmem>>, %arg15: memref<128x128xf32, #tpu.memory_space<vmem>>, %arg16: memref<128x128xf32, #tpu.memory_space<vmem>>, %arg17: memref<1x128xf32, #tpu.memory_space<vmem>>, %arg18: memref<1x128xf32, #tpu.memory_space<vmem>>, %arg19: memref<128x128xf32, #tpu.memory_space<vmem>>, %arg20: memref<1x128xf32, #tpu.memory_space<vmem>>, %arg21: memref<128x32xf32, #tpu.memory_space<vmem>>, %arg22: memref<1x32xf32, #tpu.memory_space<vmem>>, %arg23: memref<2x32xf32, #tpu.memory_space<vmem>>) attributes {dimension_semantics = [#tpu.dimension_semantics<parallel>], iteration_bounds = array<i64: 1>, scalar_prefetch = 0 : i64, scratch_operands = 0 : i64, tpu.core_type = #tpu.core_type<tc>, window_params = [{transform_indices = @transform_0, window_bounds = array<i64: 2, 128>}, {pipeline_mode = #tpu.pipeline_mode<synchronous>, transform_indices = @transform_1, window_bounds = array<i64: 128, 128>}, {pipeline_mode = #tpu.pipeline_mode<synchronous>, transform_indices = @transform_2, window_bounds = array<i64: 1, 128>}, {pipeline_mode = #tpu.pipeline_mode<synchronous>, transform_indices = @transform_3, window_bounds = array<i64: 1, 128>}, {pipeline_mode = #tpu.pipeline_mode<synchronous>, transform_indices = @transform_4, window_bounds = array<i64: 1, 128>}, {pipeline_mode = #tpu.pipeline_mode<synchronous>, transform_indices = @transform_5, window_bounds = array<i64: 128, 128>}, {pipeline_mode = #tpu.pipeline_mode<synchronous>, transform_indices = @transform_6, window_bounds = array<i64: 1, 128>}, {pipeline_mode = #tpu.pipeline_mode<synchronous>, transform_indices = @transform_7, window_bounds = array<i64: 128, 128>}, {pipeline_mode = #tpu.pipeline_mode<synchronous>, transform_indices = @transform_8, window_bounds = array<i64: 1, 128>}, {pipeline_mode = #tpu.pipeline_mode<synchronous>, transform_indices = @transform_9, window_bounds = array<i64: 128, 128>}, {pipeline_mode = #tpu.pipeline_mode<synchronous>, transform_indices = @transform_10, window_bounds = array<i64: 1, 128>}, {pipeline_mode = #tpu.pipeline_mode<synchronous>, transform_indices = @transform_11, window_bounds = array<i64: 128, 128>}, {pipeline_mode = #tpu.pipeline_mode<synchronous>, transform_indices = @transform_12, window_bounds = array<i64: 1, 128>}, {pipeline_mode = #tpu.pipeline_mode<synchronous>, transform_indices = @transform_13, window_bounds = array<i64: 128, 512>}, {pipeline_mode = #tpu.pipeline_mode<synchronous>, transform_indices = @transform_14, window_bounds = array<i64: 128, 128>}, {pipeline_mode = #tpu.pipeline_mode<synchronous>, transform_indices = @transform_15, window_bounds = array<i64: 128, 128>}, {pipeline_mode = #tpu.pipeline_mode<synchronous>, transform_indices = @transform_16, window_bounds = array<i64: 1, 128>}, {pipeline_mode = #tpu.pipeline_mode<synchronous>, transform_indices = @transform_17, window_bounds = array<i64: 1, 128>}, {pipeline_mode = #tpu.pipeline_mode<synchronous>, transform_indices = @transform_18, window_bounds = array<i64: 128, 128>}, {pipeline_mode = #tpu.pipeline_mode<synchronous>, transform_indices = @transform_19, window_bounds = array<i64: 1, 128>}, {pipeline_mode = #tpu.pipeline_mode<synchronous>, transform_indices = @transform_20, window_bounds = array<i64: 128, 32>}, {pipeline_mode = #tpu.pipeline_mode<synchronous>, transform_indices = @transform_21, window_bounds = array<i64: 1, 32>}, {transform_indices = @transform_22, window_bounds = array<i64: 2, 32>}]} {
    %c0 = arith.constant 0 : index
    %c0_0 = arith.constant 0 : index
    %0 = vector.load %arg1[%c0, %c0_0] : memref<2x128xf32, #tpu.memory_space<vmem>>, vector<2x128xf32>
    %c0_1 = arith.constant 0 : index
    %c0_2 = arith.constant 0 : index
    %1 = vector.load %arg16[%c0_1, %c0_2] : memref<128x128xf32, #tpu.memory_space<vmem>>, vector<128x128xf32>
    %c0_3 = arith.constant 0 : index
    %c0_4 = arith.constant 0 : index
    %2 = vector.load %arg2[%c0_3, %c0_4] : memref<128x128xf32, #tpu.memory_space<vmem>>, vector<128x128xf32>
    %cst = arith.constant dense<0.000000e+00> : vector<2x128xf32>
    %3 = tpu.matmul %0, %2, %cst {dimension_numbers = #tpu.dot_dimension_numbers<[1], [0], [0], [1], [0, 0, 1, 1], [], []>} : vector<2x128xf32>, vector<128x128xf32>, vector<2x128xf32> -> vector<2x128xf32>
    %c0_5 = arith.constant 0 : index
    %c0_6 = arith.constant 0 : index
    %4 = vector.load %arg3[%c0_5, %c0_6] : memref<1x128xf32, #tpu.memory_space<vmem>>, vector<1x128xf32>
    %5 = vector.broadcast %4 : vector<1x128xf32> to vector<2x128xf32>
    %6 = arith.addf %3, %5 : vector<2x128xf32>
    %7 = arith.addf %0, %6 : vector<2x128xf32>
    %c0_7 = arith.constant 0 : index
    %c0_8 = arith.constant 0 : index
    %8 = vector.load %arg4[%c0_7, %c0_8] : memref<1x128xf32, #tpu.memory_space<vmem>>, vector<1x128xf32>
    %c0_9 = arith.constant 0 : index
    %c0_10 = arith.constant 0 : index
    %9 = vector.load %arg5[%c0_9, %c0_10] : memref<1x128xf32, #tpu.memory_space<vmem>>, vector<1x128xf32>
    %cst_11 = arith.constant dense<0.000000e+00> : vector<2x128xf32>
    %10 = tpu.matmul %7, %1, %cst_11 {dimension_numbers = #tpu.dot_dimension_numbers<[1], [0], [0], [1], [0, 0, 1, 1], [], []>} : vector<2x128xf32>, vector<128x128xf32>, vector<2x128xf32> -> vector<2x128xf32>
    %11 = arith.subf %7, %10 : vector<2x128xf32>
    %12 = arith.mulf %11, %11 : vector<2x128xf32>
    %cst_12 = arith.constant dense<0.000000e+00> : vector<2x128xf32>
    %13 = tpu.matmul %12, %1, %cst_12 {dimension_numbers = #tpu.dot_dimension_numbers<[1], [0], [0], [1], [0, 0, 1, 1], [], []>} : vector<2x128xf32>, vector<128x128xf32>, vector<2x128xf32> -> vector<2x128xf32>
    %cst_13 = arith.constant 9.99999974E-6 : f32
    %14 = vector.broadcast %cst_13 : f32 to vector<2x128xf32>
    %15 = arith.addf %13, %14 : vector<2x128xf32>
    %16 = math.rsqrt %15 : vector<2x128xf32>
    %17 = arith.mulf %11, %16 : vector<2x128xf32>
    %18 = vector.broadcast %8 : vector<1x128xf32> to vector<2x128xf32>
    %19 = arith.mulf %17, %18 : vector<2x128xf32>
    %20 = vector.broadcast %9 : vector<1x128xf32> to vector<2x128xf32>
    %21 = arith.addf %19, %20 : vector<2x128xf32>
    %c0_14 = arith.constant 0 : index
    %c0_15 = arith.constant 0 : index
    %22 = vector.load %arg6[%c0_14, %c0_15] : memref<128x128xf32, #tpu.memory_space<vmem>>, vector<128x128xf32>
    %cst_16 = arith.constant dense<0.000000e+00> : vector<2x128xf32>
    %23 = tpu.matmul %21, %22, %cst_16 {dimension_numbers = #tpu.dot_dimension_numbers<[1], [0], [0], [1], [0, 0, 1, 1], [], []>} : vector<2x128xf32>, vector<128x128xf32>, vector<2x128xf32> -> vector<2x128xf32>
    %c0_17 = arith.constant 0 : index
    %c0_18 = arith.constant 0 : index
    %24 = vector.load %arg7[%c0_17, %c0_18] : memref<1x128xf32, #tpu.memory_space<vmem>>, vector<1x128xf32>
    %25 = vector.broadcast %24 : vector<1x128xf32> to vector<2x128xf32>
    %26 = arith.addf %23, %25 : vector<2x128xf32>
    %27 = arith.addf %21, %26 : vector<2x128xf32>
    %c0_19 = arith.constant 0 : index
    %c0_20 = arith.constant 0 : index
    %28 = vector.load %arg4[%c0_19, %c0_20] : memref<1x128xf32, #tpu.memory_space<vmem>>, vector<1x128xf32>
    %c0_21 = arith.constant 0 : index
    %c0_22 = arith.constant 0 : index
    %29 = vector.load %arg5[%c0_21, %c0_22] : memref<1x128xf32, #tpu.memory_space<vmem>>, vector<1x128xf32>
    %cst_23 = arith.constant dense<0.000000e+00> : vector<2x128xf32>
    %30 = tpu.matmul %27, %1, %cst_23 {dimension_numbers = #tpu.dot_dimension_numbers<[1], [0], [0], [1], [0, 0, 1, 1], [], []>} : vector<2x128xf32>, vector<128x128xf32>, vector<2x128xf32> -> vector<2x128xf32>
    %31 = arith.subf %27, %30 : vector<2x128xf32>
    %32 = arith.mulf %31, %31 : vector<2x128xf32>
    %cst_24 = arith.constant dense<0.000000e+00> : vector<2x128xf32>
    %33 = tpu.matmul %32, %1, %cst_24 {dimension_numbers = #tpu.dot_dimension_numbers<[1], [0], [0], [1], [0, 0, 1, 1], [], []>} : vector<2x128xf32>, vector<128x128xf32>, vector<2x128xf32> -> vector<2x128xf32>
    %cst_25 = arith.constant 9.99999974E-6 : f32
    %34 = vector.broadcast %cst_25 : f32 to vector<2x128xf32>
    %35 = arith.addf %33, %34 : vector<2x128xf32>
    %36 = math.rsqrt %35 : vector<2x128xf32>
    %37 = arith.mulf %31, %36 : vector<2x128xf32>
    %38 = vector.broadcast %28 : vector<1x128xf32> to vector<2x128xf32>
    %39 = arith.mulf %37, %38 : vector<2x128xf32>
    %40 = vector.broadcast %29 : vector<1x128xf32> to vector<2x128xf32>
    %41 = arith.addf %39, %40 : vector<2x128xf32>
    %c0_26 = arith.constant 0 : index
    %c0_27 = arith.constant 0 : index
    %42 = vector.load %arg8[%c0_26, %c0_27] : memref<128x128xf32, #tpu.memory_space<vmem>>, vector<128x128xf32>
    %cst_28 = arith.constant dense<0.000000e+00> : vector<2x128xf32>
    %43 = tpu.matmul %41, %42, %cst_28 {dimension_numbers = #tpu.dot_dimension_numbers<[1], [0], [0], [1], [0, 0, 1, 1], [], []>} : vector<2x128xf32>, vector<128x128xf32>, vector<2x128xf32> -> vector<2x128xf32>
    %c0_29 = arith.constant 0 : index
    %c0_30 = arith.constant 0 : index
    %44 = vector.load %arg9[%c0_29, %c0_30] : memref<1x128xf32, #tpu.memory_space<vmem>>, vector<1x128xf32>
    %45 = vector.broadcast %44 : vector<1x128xf32> to vector<2x128xf32>
    %46 = arith.addf %43, %45 : vector<2x128xf32>
    %c0_31 = arith.constant 0 : index
    %c0_32 = arith.constant 0 : index
    %47 = vector.load %arg10[%c0_31, %c0_32] : memref<128x128xf32, #tpu.memory_space<vmem>>, vector<128x128xf32>
    %cst_33 = arith.constant dense<0.000000e+00> : vector<2x128xf32>
    %48 = tpu.matmul %41, %47, %cst_33 {dimension_numbers = #tpu.dot_dimension_numbers<[1], [0], [0], [1], [0, 0, 1, 1], [], []>} : vector<2x128xf32>, vector<128x128xf32>, vector<2x128xf32> -> vector<2x128xf32>
    %c0_34 = arith.constant 0 : index
    %c0_35 = arith.constant 0 : index
    %49 = vector.load %arg11[%c0_34, %c0_35] : memref<1x128xf32, #tpu.memory_space<vmem>>, vector<1x128xf32>
    %50 = vector.broadcast %49 : vector<1x128xf32> to vector<2x128xf32>
    %51 = arith.addf %48, %50 : vector<2x128xf32>
    %c0_36 = arith.constant 0 : index
    %c0_37 = arith.constant 0 : index
    %52 = vector.load %arg12[%c0_36, %c0_37] : memref<128x128xf32, #tpu.memory_space<vmem>>, vector<128x128xf32>
    %cst_38 = arith.constant dense<0.000000e+00> : vector<2x128xf32>
    %53 = tpu.matmul %41, %52, %cst_38 {dimension_numbers = #tpu.dot_dimension_numbers<[1], [0], [0], [1], [0, 0, 1, 1], [], []>} : vector<2x128xf32>, vector<128x128xf32>, vector<2x128xf32> -> vector<2x128xf32>
    %c0_39 = arith.constant 0 : index
    %c0_40 = arith.constant 0 : index
    %54 = vector.load %arg13[%c0_39, %c0_40] : memref<1x128xf32, #tpu.memory_space<vmem>>, vector<1x128xf32>
    %55 = vector.broadcast %54 : vector<1x128xf32> to vector<2x128xf32>
    %56 = arith.addf %53, %55 : vector<2x128xf32>
    %c0_41 = arith.constant 0 : index
    %c0_42 = arith.constant 0 : index
    %57 = vector.load %arg14[%c0_41, %c0_42] : memref<128x512xf32, #tpu.memory_space<vmem>>, vector<128x512xf32>
    %cst_43 = arith.constant dense<0.000000e+00> : vector<2x512xf32>
    %58 = tpu.matmul %51, %57, %cst_43 {dimension_numbers = #tpu.dot_dimension_numbers<[1], [0], [0], [1], [0, 0, 1, 1], [], []>} : vector<2x128xf32>, vector<128x512xf32>, vector<2x512xf32> -> vector<2x512xf32>
    %c0_44 = arith.constant 0 : index
    %c0_45 = arith.constant 0 : index
    %59 = vector.load %arg14[%c0_44, %c0_45] : memref<128x512xf32, #tpu.memory_space<vmem>>, vector<128x512xf32>
    %cst_46 = arith.constant dense<0.000000e+00> : vector<2x512xf32>
    %60 = tpu.matmul %56, %59, %cst_46 {dimension_numbers = #tpu.dot_dimension_numbers<[1], [0], [0], [1], [0, 0, 1, 1], [], []>} : vector<2x128xf32>, vector<128x512xf32>, vector<2x512xf32> -> vector<2x512xf32>
    %c0_47 = arith.constant 0 : index
    %c0_48 = arith.constant 0 : index
    %61 = vector.load %arg15[%c0_47, %c0_48] : memref<128x128xf32, #tpu.memory_space<vmem>>, vector<128x128xf32>
    %62 = vector.extract_strided_slice %58 {offsets = [0, 0], sizes = [2, 128], strides = [1, 1]} : vector<2x512xf32> to vector<2x128xf32>
    %63 = arith.mulf %46, %62 : vector<2x128xf32>
    %cst_49 = arith.constant dense<0.000000e+00> : vector<2x128xf32>
    %64 = tpu.matmul %63, %61, %cst_49 {dimension_numbers = #tpu.dot_dimension_numbers<[1], [0], [0], [1], [0, 0, 1, 1], [], []>} : vector<2x128xf32>, vector<128x128xf32>, vector<2x128xf32> -> vector<2x128xf32>
    %65 = vector.extract_strided_slice %58 {offsets = [0, 128], sizes = [2, 128], strides = [1, 1]} : vector<2x512xf32> to vector<2x128xf32>
    %66 = arith.mulf %46, %65 : vector<2x128xf32>
    %cst_50 = arith.constant dense<0.000000e+00> : vector<2x128xf32>
    %67 = tpu.matmul %66, %61, %cst_50 {dimension_numbers = #tpu.dot_dimension_numbers<[1], [0], [0], [1], [0, 0, 1, 1], [], []>} : vector<2x128xf32>, vector<128x128xf32>, vector<2x128xf32> -> vector<2x128xf32>
    %68 = vector.extract_strided_slice %58 {offsets = [0, 256], sizes = [2, 128], strides = [1, 1]} : vector<2x512xf32> to vector<2x128xf32>
    %69 = arith.mulf %46, %68 : vector<2x128xf32>
    %cst_51 = arith.constant dense<0.000000e+00> : vector<2x128xf32>
    %70 = tpu.matmul %69, %61, %cst_51 {dimension_numbers = #tpu.dot_dimension_numbers<[1], [0], [0], [1], [0, 0, 1, 1], [], []>} : vector<2x128xf32>, vector<128x128xf32>, vector<2x128xf32> -> vector<2x128xf32>
    %71 = vector.extract_strided_slice %58 {offsets = [0, 384], sizes = [2, 128], strides = [1, 1]} : vector<2x512xf32> to vector<2x128xf32>
    %72 = arith.mulf %46, %71 : vector<2x128xf32>
    %cst_52 = arith.constant dense<0.000000e+00> : vector<2x128xf32>
    %73 = tpu.matmul %72, %61, %cst_52 {dimension_numbers = #tpu.dot_dimension_numbers<[1], [0], [0], [1], [0, 0, 1, 1], [], []>} : vector<2x128xf32>, vector<128x128xf32>, vector<2x128xf32> -> vector<2x128xf32>
    %74 = arith.maximumf %64, %67 : vector<2x128xf32>
    %75 = arith.maximumf %74, %70 : vector<2x128xf32>
    %76 = arith.maximumf %75, %73 : vector<2x128xf32>
    %77 = arith.subf %64, %76 : vector<2x128xf32>
    %78 = math.exp %77 : vector<2x128xf32>
    %79 = arith.subf %67, %76 : vector<2x128xf32>
    %80 = math.exp %79 : vector<2x128xf32>
    %81 = arith.subf %70, %76 : vector<2x128xf32>
    %82 = math.exp %81 : vector<2x128xf32>
    %83 = arith.subf %73, %76 : vector<2x128xf32>
    %84 = math.exp %83 : vector<2x128xf32>
    %85 = arith.addf %78, %80 : vector<2x128xf32>
    %86 = arith.addf %85, %82 : vector<2x128xf32>
    %87 = arith.addf %86, %84 : vector<2x128xf32>
    %88 = tpu.reciprocal %87 {approx = true} : vector<2x128xf32> -> vector<2x128xf32>
    %89 = arith.mulf %78, %88 : vector<2x128xf32>
    %90 = vector.extract_strided_slice %60 {offsets = [0, 0], sizes = [2, 128], strides = [1, 1]} : vector<2x512xf32> to vector<2x128xf32>
    %91 = arith.mulf %89, %90 : vector<2x128xf32>
    %92 = arith.mulf %80, %88 : vector<2x128xf32>
    %93 = vector.extract_strided_slice %60 {offsets = [0, 128], sizes = [2, 128], strides = [1, 1]} : vector<2x512xf32> to vector<2x128xf32>
    %94 = arith.mulf %92, %93 : vector<2x128xf32>
    %95 = arith.addf %91, %94 : vector<2x128xf32>
    %96 = arith.mulf %82, %88 : vector<2x128xf32>
    %97 = vector.extract_strided_slice %60 {offsets = [0, 256], sizes = [2, 128], strides = [1, 1]} : vector<2x512xf32> to vector<2x128xf32>
    %98 = arith.mulf %96, %97 : vector<2x128xf32>
    %99 = arith.addf %95, %98 : vector<2x128xf32>
    %100 = arith.mulf %84, %88 : vector<2x128xf32>
    %101 = vector.extract_strided_slice %60 {offsets = [0, 384], sizes = [2, 128], strides = [1, 1]} : vector<2x512xf32> to vector<2x128xf32>
    %102 = arith.mulf %100, %101 : vector<2x128xf32>
    %103 = arith.addf %99, %102 : vector<2x128xf32>
    %104 = arith.addf %41, %103 : vector<2x128xf32>
    %c0_53 = arith.constant 0 : index
    %c0_54 = arith.constant 0 : index
    %105 = vector.load %arg17[%c0_53, %c0_54] : memref<1x128xf32, #tpu.memory_space<vmem>>, vector<1x128xf32>
    %c0_55 = arith.constant 0 : index
    %c0_56 = arith.constant 0 : index
    %106 = vector.load %arg18[%c0_55, %c0_56] : memref<1x128xf32, #tpu.memory_space<vmem>>, vector<1x128xf32>
    %cst_57 = arith.constant dense<0.000000e+00> : vector<2x128xf32>
    %107 = tpu.matmul %104, %1, %cst_57 {dimension_numbers = #tpu.dot_dimension_numbers<[1], [0], [0], [1], [0, 0, 1, 1], [], []>} : vector<2x128xf32>, vector<128x128xf32>, vector<2x128xf32> -> vector<2x128xf32>
    %108 = arith.subf %104, %107 : vector<2x128xf32>
    %109 = arith.mulf %108, %108 : vector<2x128xf32>
    %cst_58 = arith.constant dense<0.000000e+00> : vector<2x128xf32>
    %110 = tpu.matmul %109, %1, %cst_58 {dimension_numbers = #tpu.dot_dimension_numbers<[1], [0], [0], [1], [0, 0, 1, 1], [], []>} : vector<2x128xf32>, vector<128x128xf32>, vector<2x128xf32> -> vector<2x128xf32>
    %cst_59 = arith.constant 9.99999974E-6 : f32
    %111 = vector.broadcast %cst_59 : f32 to vector<2x128xf32>
    %112 = arith.addf %110, %111 : vector<2x128xf32>
    %113 = math.rsqrt %112 : vector<2x128xf32>
    %114 = arith.mulf %108, %113 : vector<2x128xf32>
    %115 = vector.broadcast %105 : vector<1x128xf32> to vector<2x128xf32>
    %116 = arith.mulf %114, %115 : vector<2x128xf32>
    %117 = vector.broadcast %106 : vector<1x128xf32> to vector<2x128xf32>
    %118 = arith.addf %116, %117 : vector<2x128xf32>
    %c0_60 = arith.constant 0 : index
    %c0_61 = arith.constant 0 : index
    %119 = vector.load %arg19[%c0_60, %c0_61] : memref<128x128xf32, #tpu.memory_space<vmem>>, vector<128x128xf32>
    %cst_62 = arith.constant dense<0.000000e+00> : vector<2x128xf32>
    %120 = tpu.matmul %118, %119, %cst_62 {dimension_numbers = #tpu.dot_dimension_numbers<[1], [0], [0], [1], [0, 0, 1, 1], [], []>} : vector<2x128xf32>, vector<128x128xf32>, vector<2x128xf32> -> vector<2x128xf32>
    %c0_63 = arith.constant 0 : index
    %c0_64 = arith.constant 0 : index
    %121 = vector.load %arg20[%c0_63, %c0_64] : memref<1x128xf32, #tpu.memory_space<vmem>>, vector<1x128xf32>
    %122 = vector.broadcast %121 : vector<1x128xf32> to vector<2x128xf32>
    %123 = arith.addf %120, %122 : vector<2x128xf32>
    %124 = arith.addf %118, %123 : vector<2x128xf32>
    %c0_65 = arith.constant 0 : index
    %c0_66 = arith.constant 0 : index
    %125 = vector.load %arg17[%c0_65, %c0_66] : memref<1x128xf32, #tpu.memory_space<vmem>>, vector<1x128xf32>
    %c0_67 = arith.constant 0 : index
    %c0_68 = arith.constant 0 : index
    %126 = vector.load %arg18[%c0_67, %c0_68] : memref<1x128xf32, #tpu.memory_space<vmem>>, vector<1x128xf32>
    %cst_69 = arith.constant dense<0.000000e+00> : vector<2x128xf32>
    %127 = tpu.matmul %124, %1, %cst_69 {dimension_numbers = #tpu.dot_dimension_numbers<[1], [0], [0], [1], [0, 0, 1, 1], [], []>} : vector<2x128xf32>, vector<128x128xf32>, vector<2x128xf32> -> vector<2x128xf32>
    %128 = arith.subf %124, %127 : vector<2x128xf32>
    %129 = arith.mulf %128, %128 : vector<2x128xf32>
    %cst_70 = arith.constant dense<0.000000e+00> : vector<2x128xf32>
    %130 = tpu.matmul %129, %1, %cst_70 {dimension_numbers = #tpu.dot_dimension_numbers<[1], [0], [0], [1], [0, 0, 1, 1], [], []>} : vector<2x128xf32>, vector<128x128xf32>, vector<2x128xf32> -> vector<2x128xf32>
    %cst_71 = arith.constant 9.99999974E-6 : f32
    %131 = vector.broadcast %cst_71 : f32 to vector<2x128xf32>
    %132 = arith.addf %130, %131 : vector<2x128xf32>
    %133 = math.rsqrt %132 : vector<2x128xf32>
    %134 = arith.mulf %128, %133 : vector<2x128xf32>
    %135 = vector.broadcast %125 : vector<1x128xf32> to vector<2x128xf32>
    %136 = arith.mulf %134, %135 : vector<2x128xf32>
    %137 = vector.broadcast %126 : vector<1x128xf32> to vector<2x128xf32>
    %138 = arith.addf %136, %137 : vector<2x128xf32>
    %c0_72 = arith.constant 0 : index
    %c0_73 = arith.constant 0 : index
    %139 = vector.load %arg21[%c0_72, %c0_73] : memref<128x32xf32, #tpu.memory_space<vmem>>, vector<128x32xf32>
    %cst_74 = arith.constant dense<0.000000e+00> : vector<2x32xf32>
    %140 = tpu.matmul %138, %139, %cst_74 {dimension_numbers = #tpu.dot_dimension_numbers<[1], [0], [0], [1], [0, 0, 1, 1], [], []>} : vector<2x128xf32>, vector<128x32xf32>, vector<2x32xf32> -> vector<2x32xf32>
    %c0_75 = arith.constant 0 : index
    %c0_76 = arith.constant 0 : index
    %141 = vector.load %arg22[%c0_75, %c0_76] : memref<1x32xf32, #tpu.memory_space<vmem>>, vector<1x32xf32>
    %142 = vector.broadcast %141 : vector<1x32xf32> to vector<2x32xf32>
    %143 = arith.addf %140, %142 : vector<2x32xf32>
    %c0_77 = arith.constant 0 : index
    %c0_78 = arith.constant 0 : index
    %144 = vector.load %arg23[%c0_77, %c0_78] : memref<2x32xf32, #tpu.memory_space<vmem>>, vector<2x32xf32>
    tpu.vector_store %arg23[%c0_77, %c0_78], %143 {strides = array<i32>} : memref<2x32xf32, #tpu.memory_space<vmem>>, vector<2x32xf32>,
    return
  }
  func.func @transform_0(%arg0: i32) -> (i32, i32) {
    %c0_i32 = arith.constant 0 : i32
    %c0_i32_0 = arith.constant 0 : i32
    return %arg0, %c0_i32 : i32, i32
  }
  func.func @transform_1(%arg0: i32) -> (i32, i32) {
    %c0_i32 = arith.constant 0 : i32
    %c0_i32_0 = arith.constant 0 : i32
    %c0_i32_1 = arith.constant 0 : i32
    return %c0_i32, %c0_i32_0 : i32, i32
  }
  func.func @transform_2(%arg0: i32) -> (i32, i32) {
    %c0_i32 = arith.constant 0 : i32
    %c0_i32_0 = arith.constant 0 : i32
    %c0_i32_1 = arith.constant 0 : i32
    return %c0_i32, %c0_i32_0 : i32, i32
  }
  func.func @transform_3(%arg0: i32) -> (i32, i32) {
    %c0_i32 = arith.constant 0 : i32
    %c0_i32_0 = arith.constant 0 : i32
    %c0_i32_1 = arith.constant 0 : i32
    return %c0_i32, %c0_i32_0 : i32, i32
  }
  func.func @transform_4(%arg0: i32) -> (i32, i32) {
    %c0_i32 = arith.constant 0 : i32
    %c0_i32_0 = arith.constant 0 : i32
    %c0_i32_1 = arith.constant 0 : i32
    return %c0_i32, %c0_i32_0 : i32, i32
  }
  func.func @transform_5(%arg0: i32) -> (i32, i32) {
    %c0_i32 = arith.constant 0 : i32
    %c0_i32_0 = arith.constant 0 : i32
    %c0_i32_1 = arith.constant 0 : i32
    return %c0_i32, %c0_i32_0 : i32, i32
  }
  func.func @transform_6(%arg0: i32) -> (i32, i32) {
    %c0_i32 = arith.constant 0 : i32
    %c0_i32_0 = arith.constant 0 : i32
    %c0_i32_1 = arith.constant 0 : i32
    return %c0_i32, %c0_i32_0 : i32, i32
  }
  func.func @transform_7(%arg0: i32) -> (i32, i32) {
    %c0_i32 = arith.constant 0 : i32
    %c0_i32_0 = arith.constant 0 : i32
    %c0_i32_1 = arith.constant 0 : i32
    return %c0_i32, %c0_i32_0 : i32, i32
  }
  func.func @transform_8(%arg0: i32) -> (i32, i32) {
    %c0_i32 = arith.constant 0 : i32
    %c0_i32_0 = arith.constant 0 : i32
    %c0_i32_1 = arith.constant 0 : i32
    return %c0_i32, %c0_i32_0 : i32, i32
  }
  func.func @transform_9(%arg0: i32) -> (i32, i32) {
    %c0_i32 = arith.constant 0 : i32
    %c0_i32_0 = arith.constant 0 : i32
    %c0_i32_1 = arith.constant 0 : i32
    return %c0_i32, %c0_i32_0 : i32, i32
  }
  func.func @transform_10(%arg0: i32) -> (i32, i32) {
    %c0_i32 = arith.constant 0 : i32
    %c0_i32_0 = arith.constant 0 : i32
    %c0_i32_1 = arith.constant 0 : i32
    return %c0_i32, %c0_i32_0 : i32, i32
  }
  func.func @transform_11(%arg0: i32) -> (i32, i32) {
    %c0_i32 = arith.constant 0 : i32
    %c0_i32_0 = arith.constant 0 : i32
    %c0_i32_1 = arith.constant 0 : i32
    return %c0_i32, %c0_i32_0 : i32, i32
  }
  func.func @transform_12(%arg0: i32) -> (i32, i32) {
    %c0_i32 = arith.constant 0 : i32
    %c0_i32_0 = arith.constant 0 : i32
    %c0_i32_1 = arith.constant 0 : i32
    return %c0_i32, %c0_i32_0 : i32, i32
  }
  func.func @transform_13(%arg0: i32) -> (i32, i32) {
    %c0_i32 = arith.constant 0 : i32
    %c0_i32_0 = arith.constant 0 : i32
    %c0_i32_1 = arith.constant 0 : i32
    return %c0_i32, %c0_i32_0 : i32, i32
  }
  func.func @transform_14(%arg0: i32) -> (i32, i32) {
    %c0_i32 = arith.constant 0 : i32
    %c0_i32_0 = arith.constant 0 : i32
    %c0_i32_1 = arith.constant 0 : i32
    return %c0_i32, %c0_i32_0 : i32, i32
  }
  func.func @transform_15(%arg0: i32) -> (i32, i32) {
    %c0_i32 = arith.constant 0 : i32
    %c0_i32_0 = arith.constant 0 : i32
    %c0_i32_1 = arith.constant 0 : i32
    return %c0_i32, %c0_i32_0 : i32, i32
  }
  func.func @transform_16(%arg0: i32) -> (i32, i32) {
    %c0_i32 = arith.constant 0 : i32
    %c0_i32_0 = arith.constant 0 : i32
    %c0_i32_1 = arith.constant 0 : i32
    return %c0_i32, %c0_i32_0 : i32, i32
  }
  func.func @transform_17(%arg0: i32) -> (i32, i32) {
    %c0_i32 = arith.constant 0 : i32
    %c0_i32_0 = arith.constant 0 : i32
    %c0_i32_1 = arith.constant 0 : i32
    return %c0_i32, %c0_i32_0 : i32, i32
  }
  func.func @transform_18(%arg0: i32) -> (i32, i32) {
    %c0_i32 = arith.constant 0 : i32
    %c0_i32_0 = arith.constant 0 : i32
    %c0_i32_1 = arith.constant 0 : i32
    return %c0_i32, %c0_i32_0 : i32, i32
  }
  func.func @transform_19(%arg0: i32) -> (i32, i32) {
    %c0_i32 = arith.constant 0 : i32
    %c0_i32_0 = arith.constant 0 : i32
    %c0_i32_1 = arith.constant 0 : i32
    return %c0_i32, %c0_i32_0 : i32, i32
  }
  func.func @transform_20(%arg0: i32) -> (i32, i32) {
    %c0_i32 = arith.constant 0 : i32
    %c0_i32_0 = arith.constant 0 : i32
    %c0_i32_1 = arith.constant 0 : i32
    return %c0_i32, %c0_i32_0 : i32, i32
  }
  func.func @transform_21(%arg0: i32) -> (i32, i32) {
    %c0_i32 = arith.constant 0 : i32
    %c0_i32_0 = arith.constant 0 : i32
    %c0_i32_1 = arith.constant 0 : i32
    return %c0_i32, %c0_i32_0 : i32, i32
  }
  func.func @transform_22(%arg0: i32) -> (i32, i32) {
    %c0_i32 = arith.constant 0 : i32
    %c0_i32_0 = arith.constant 0 : i32
    return %arg0, %c0_i32 : i32, i32
  }
}

</mosaic_0001>

<bundles_post_ra>
// kernel: tpu_custom_call.1
= control target key start
LH: loop header
LB: loop body
LE: loop exit
PB: predicated region body
PF: predicated region fallthrough
CT: control target
= control target key end

     0   :  { %s4829_s0 = inlined_call_operand.vmem [shape: f32[2,128], index: 0, kind: input, shape index: {}]   ;;  %s4830_s1 = inlined_call_operand.vmem [shape: f32[128,128], index: 1, kind: input, shape index: {}]   ;;  %s4831_s2 = inlined_call_operand.vmem [shape: f32[1,128], index: 2, kind: input, shape index: {}]   ;;  %s4832_s3 = inlined_call_operand.vmem [shape: f32[1,128], index: 3, kind: input, shape index: {}]   ;;  %s4833_s4 = inlined_call_operand.vmem [shape: f32[1,128], index: 4, kind: input, shape index: {}]   ;;  %s4834_s5 = inlined_call_operand.hbm [shape: f32[128,128], index: 5, kind: input, shape index: {}]   ;;  %s4835_s6 = inlined_call_operand.vmem [shape: f32[1,128], index: 6, kind: input, shape index: {}]   ;;  %s4836_s7 = inlined_call_operand.hbm [shape: f32[128,128], index: 7, kind: input, shape index: {}]   ;;  %s4837_s8 = inlined_call_operand.vmem [shape: f32[1,128], index: 8, kind: input, shape index: {}]   ;;  %s4838_s9 = inlined_call_operand.hbm [shape: f32[128,128], index: 9, kind: input, shape index: {}]   ;;  %s4839_s10 = inlined_call_operand.vmem [shape: f32[1,128], index: 10, kind: input, shape index: {}]   ;;  %s4840_s11 = inlined_call_operand.hbm [shape: f32[128,128], index: 11, kind: input, shape index: {}]   ;;  %s4841_s12 = inlined_call_operand.vmem [shape: f32[1,128], index: 12, kind: input, shape index: {}]   ;;  %s4842_s13 = inlined_call_operand.hbm [shape: f32[128,512], index: 13, kind: input, shape index: {}]   ;;  %s4843_s14 = inlined_call_operand.hbm [shape: f32[128,128], index: 14, kind: input, shape index: {}]   ;;  %s4844_s15 = inlined_call_operand.hbm [shape: f32[128,128], index: 15, kind: input, shape index: {}]   ;;  %s4845_s16 = inlined_call_operand.vmem [shape: f32[1,128], index: 16, kind: input, shape index: {}]   ;;  %s4846_s17 = inlined_call_operand.vmem [shape: f32[1,128], index: 17, kind: input, shape index: {}]   ;;  %s4847_s18 = inlined_call_operand.hbm [shape: f32[128,128], index: 18, kind: input, shape index: {}]   ;;  %s4848_s19 = inlined_call_operand.vmem [shape: f32[1,128], index: 19, kind: input, shape index: {}]   ;;  %s4849_s20 = inlined_call_operand.vmem [shape: f32[128,32], index: 20, kind: input, shape index: {}]   ;;  %s4850_s21 = inlined_call_operand.vmem [shape: f32[1,32], index: 21, kind: input, shape index: {}]   ;;  %s4851_s22 = inlined_call_operand.hbm [shape: f32[2,32], index: 22, kind: output, shape index: {}]  }
   0x1   :  { %4854 = sst [smem:[#allocation23_spill]] %s4829_s0 }
   0x2   :  { %4855 = sst [smem:[#allocation24_spill]] %s4830_s1 }
   0x3   :  { %4856 = sst [smem:[#allocation25_spill]] %s4831_s2 }
   0x4   :  { %4857 = sst [smem:[#allocation26_spill]] %s4832_s3 }
   0x5   :  { %4858 = sst [smem:[#allocation27_spill]] %s4833_s4 }
   0x6   :  { %4859 = sst [smem:[#allocation28_spill]] %s4834_s5 }
   0x7   :  { %4860 = sst [smem:[#allocation29_spill]] %s4835_s6 }
   0x8   :  { %27 = vsyncpa [#allocation3], 0 }
   0x9   :  { %28 = vsyncpa [#allocation6], 0 }
   0xa   :  { %29 = vsyncpa [#allocation9], 0 }
   0xb   :  { %30 = vsyncpa [#allocation12], 0 }
   0xc   :  { %31 = vsyncpa [#allocation15], 0 }
   0xd   :  { %32 = vsyncpa [#allocation4], 0  ;;  %s3991_s3 = smov [#allocation5]   ;;  %s3992_s29 = smov [#allocation8]  }
   0xe   :  { %s62_s28 = sshll.u32 %s3991_s3, 4  ;;  %s90_s30 = sshll.u32 %s3992_s29, 4  ;;  %s63_s28 = int_to_ptr.vmem [resolvable:$true] %s62_s28  ;;  %s4122_s30 = int_to_ptr.vmem [resolvable:$true] %s90_s30 }
   0xf   :  { %s3781_s23 = scalar_lea.hbm %s4836_s7, 2048 }
  0x10   :  { %p3782_p0 = scmp.ne.s32.totalorder %s4836_s7, %s3781_s23  ;;  %p3785_p1 = scmp.lt.u32.totalorder %s3781_s23, %s4836_s7 }
  0x12   :  { %p3787_p2 = pnand %p3785_p1, %p3782_p0 }
  0x14   :  { %3790 = shalt.err (!%p3787_p2)
}
  0x15   :  { %s3791_s25 = scalar_lea.vmem %s63_s28, 2048  ;;  %p3796_p4 = scmp.lt.s32.totalorder %s63_s28, %s63_s28 }
  0x16   :  { %p3792_p3 = scmp.ne.s32.totalorder %s63_s28, %s3791_s25  ;;  %p3797_p5 = scmp.lt.s32.totalorder %s3791_s25, %s3791_s25 }
  0x18   :  { %p3798_p6 = por %p3797_p5, %p3796_p4 }
  0x1a   :  { %p3799_p7 = pnand %p3798_p6, %p3792_p3 }
  0x1c   :  { %3802 = shalt.err (!%p3799_p7)
}
  0x1d   :  { %s3993_s26 = smov 128   ;;  %s3994_s2 = smov 8  }
  0x1e   :  { %68 = dma.hbm_to_vmem [thread:$0]  %s4836_s7, 2048, %s63_s28, [#allocation6], %s3993_s26, %s3993_s26, %s3994_s2  }
  0x1f   :  { %s3803_s0 = scalar_lea.hbm %s4840_s11, 2048 }
  0x20   :  { %p3804_p8 = scmp.ne.s32.totalorder %s4840_s11, %s3803_s0  ;;  %p3807_p9 = scmp.lt.u32.totalorder %s3803_s0, %s4840_s11 }
  0x22   :  { %p3809_p10 = pnand %p3807_p9, %p3804_p8 }
  0x24   :  { %3812 = shalt.err (!%p3809_p10)
}
  0x25   :  { %s3813_s6 = scalar_lea.vmem %s4122_s30, 2048  ;;  %p3818_p12 = scmp.lt.s32.totalorder %s4122_s30, %s4122_s30 }
  0x26   :  { %p3814_p11 = scmp.ne.s32.totalorder %s4122_s30, %s3813_s6  ;;  %p3819_p13 = scmp.lt.s32.totalorder %s3813_s6, %s3813_s6 }
  0x28   :  { %p3820_p0 = por %p3819_p13, %p3818_p12 }
  0x2a   :  { %p3821_p1 = pnand %p3820_p0, %p3814_p11 }
  0x2c   :  { %3824 = shalt.err (!%p3821_p1)
}
  0x2d   :  { %96 = dma.hbm_to_vmem [thread:$0]  %s4840_s11, 2048, %s4122_s30, [#allocation9], %s3993_s26, %s3993_s26, %s3994_s2  }
  0x2e   :  { %s3995_s25 = smov [#allocation11]   ;;  %s3996_s3 = smov [#allocation2]  }
  0x2f   :  { %s116_s27 = sshll.u32 %s3995_s25, 4  ;;  %s48_s29 = sshll.u32 %s3996_s3, 4  ;;  %s117_s27 = int_to_ptr.vmem [resolvable:$true] %s116_s27  ;;  %s4159_s29 = int_to_ptr.vmem [resolvable:$true] %s48_s29 }
  0x30   :  { %s3825_s23 = scalar_lea.hbm %s4843_s14, 2048 }
  0x31   :  { %p3826_p2 = scmp.ne.s32.totalorder %s4843_s14, %s3825_s23  ;;  %p3829_p3 = scmp.lt.u32.totalorder %s3825_s23, %s4843_s14 }
  0x33   :  { %p3831_p4 = pnand %p3829_p3, %p3826_p2 }
  0x35   :  { %3834 = shalt.err (!%p3831_p4)
}
  0x36   :  { %s3835_s11 = scalar_lea.vmem %s117_s27, 2048  ;;  %p3840_p6 = scmp.lt.s32.totalorder %s117_s27, %s117_s27 }
  0x37   :  { %p3836_p5 = scmp.ne.s32.totalorder %s117_s27, %s3835_s11  ;;  %p3841_p7 = scmp.lt.s32.totalorder %s3835_s11, %s3835_s11 }
  0x39   :  { %p3842_p8 = por %p3841_p7, %p3840_p6 }
  0x3b   :  { %p3843_p9 = pnand %p3842_p8, %p3836_p5 }
  0x3d   :  { %3846 = shalt.err (!%p3843_p9)
}
  0x3e   :  { %122 = dma.hbm_to_vmem [thread:$0]  %s4843_s14, 2048, %s117_s27, [#allocation12], %s3993_s26, %s3993_s26, %s3994_s2  }
  0x3f   :  { %s4861_s3 = sld [smem:[#allocation28_spill]] }
  0x45   :  { %s3847_s4 = scalar_lea.hbm %s4861_s3, 2048 }
  0x46   :  { %p3848_p10 = scmp.ne.s32.totalorder %s4861_s3, %s3847_s4  ;;  %p3851_p11 = scmp.lt.u32.totalorder %s3847_s4, %s4861_s3 }
  0x48   :  { %p3853_p12 = pnand %p3851_p11, %p3848_p10 }
  0x4a   :  { %3856 = shalt.err (!%p3853_p12)
}
  0x4b   :  { %s3857_s24 = scalar_lea.vmem %s4159_s29, 2048  ;;  %p3862_p0 = scmp.lt.s32.totalorder %s4159_s29, %s4159_s29 }
  0x4c   :  { %p3858_p13 = scmp.ne.s32.totalorder %s4159_s29, %s3857_s24  ;;  %p3863_p1 = scmp.lt.s32.totalorder %s3857_s24, %s3857_s24 }
  0x4e   :  { %p3864_p2 = por %p3863_p1, %p3862_p0 }
  0x50   :  { %p3865_p3 = pnand %p3864_p2, %p3858_p13 }
  0x52   :  { %3868 = shalt.err (!%p3865_p3)
}
  0x53   :  { %54 = dma.hbm_to_vmem [thread:$0]  %s4861_s3, 2048, %s4159_s29, [#allocation3], %s3993_s26, %s3993_s26, %s3994_s2  }
  0x54   :  { %s3997_s6 = smov [#allocation7]   ;;  %s3998_s30 = smov [#allocation10]  }
  0x55   :  { %s76_s11 = sshll.u32 %s3997_s6, 4  ;;  %s104_s7 = sshll.u32 %s3998_s30, 4  ;;  %s77_s11 = int_to_ptr.vmem [resolvable:$true] %s76_s11  ;;  %s4196_s7 = int_to_ptr.vmem [resolvable:$true] %s104_s7 }
  0x56   :  { %s3869_s4 = scalar_lea.hbm %s4838_s9, 2048 }
  0x57   :  { %p3870_p4 = scmp.ne.s32.totalorder %s4838_s9, %s3869_s4  ;;  %p3873_p5 = scmp.lt.u32.totalorder %s3869_s4, %s4838_s9 }
  0x59   :  { %p3875_p6 = pnand %p3873_p5, %p3870_p4 }
  0x5b   :  { %3878 = shalt.err (!%p3875_p6)
}
  0x5c   :  { %s3879_s29 = scalar_lea.vmem %s77_s11, 2048  ;;  %p3884_p8 = scmp.lt.s32.totalorder %s77_s11, %s77_s11 }
  0x5d   :  { %p3880_p7 = scmp.ne.s32.totalorder %s77_s11, %s3879_s29  ;;  %p3885_p9 = scmp.lt.s32.totalorder %s3879_s29, %s3879_s29 }
  0x5f   :  { %p3886_p10 = por %p3885_p9, %p3884_p8 }
  0x61   :  { %p3887_p11 = pnand %p3886_p10, %p3880_p7 }
  0x63   :  { %3890 = shalt.err (!%p3887_p11)
}
  0x64   :  { %82 = dma.hbm_to_vmem [thread:$0]  %s4838_s9, 2048, %s77_s11, [#allocation6], %s3993_s26, %s3993_s26, %s3994_s2  }
  0x65   :  { %s3891_s6 = scalar_lea.hbm %s4842_s13, 8192 }
  0x66   :  { %p3892_p12 = scmp.ne.s32.totalorder %s4842_s13, %s3891_s6  ;;  %p3895_p13 = scmp.lt.u32.totalorder %s3891_s6, %s4842_s13 }
  0x68   :  { %p3897_p0 = pnand %p3895_p13, %p3892_p12 }
  0x6a   :  { %3900 = shalt.err (!%p3897_p0)
}
  0x6b   :  { %s3901_s0 = scalar_lea.vmem %s4196_s7, 8192  ;;  %p3906_p2 = scmp.lt.s32.totalorder %s4196_s7, %s4196_s7 }
  0x6c   :  { %p3902_p1 = scmp.ne.s32.totalorder %s4196_s7, %s3901_s0  ;;  %p3907_p3 = scmp.lt.s32.totalorder %s3901_s0, %s3901_s0 }
  0x6e   :  { %p3908_p4 = por %p3907_p3, %p3906_p2 }
  0x70   :  { %p3909_p5 = pnand %p3908_p4, %p3902_p1 }
  0x72   :  { %3912 = shalt.err (!%p3909_p5)
}
  0x73   :  { %s3999_s9 = smov 512   ;;  %s4000_s11 = smov 32  }
  0x74   :  { %110 = dma.hbm_to_vmem [thread:$0]  %s4842_s13, 8192, %s4196_s7, [#allocation9], %s3999_s9, %s3999_s9, %s4000_s11  }
  0x75   :  { %s4001_s5 = smov [#allocation13]   ;;  %s4002_s3 = smov [#allocation14]  }
  0x76   :  { %s128_s29 = sshll.u32 %s4001_s5, 4  ;;  %s144_s24 = sshll.u32 %s4002_s3, 4  ;;  %s129_s29 = int_to_ptr.vmem [resolvable:$true] %s128_s29  ;;  %s4230_s24 = int_to_ptr.vmem [resolvable:$true] %s144_s24 }
  0x77   :  { %s3913_s6 = scalar_lea.hbm %s4844_s15, 2048 }
  0x78   :  { %p3914_p6 = scmp.ne.s32.totalorder %s4844_s15, %s3913_s6  ;;  %p3917_p7 = scmp.lt.u32.totalorder %s3913_s6, %s4844_s15 }
  0x7a   :  { %p3919_p8 = pnand %p3917_p7, %p3914_p6 }
  0x7c   :  { %3922 = shalt.err (!%p3919_p8)
}
  0x7d   :  { %s3923_s13 = scalar_lea.vmem %s129_s29, 2048  ;;  %p3928_p10 = scmp.lt.s32.totalorder %s129_s29, %s129_s29 }
  0x7e   :  { %p3924_p9 = scmp.ne.s32.totalorder %s129_s29, %s3923_s13  ;;  %p3929_p11 = scmp.lt.s32.totalorder %s3923_s13, %s3923_s13 }
  0x80   :  { %p3930_p12 = por %p3929_p11, %p3928_p10 }
  0x82   :  { %p3931_p13 = pnand %p3930_p12, %p3924_p9 }
  0x84   :  { %3934 = shalt.err (!%p3931_p13)
}
  0x85   :  { %134 = dma.hbm_to_vmem [thread:$0]  %s4844_s15, 2048, %s129_s29, [#allocation12], %s3993_s26, %s3993_s26, %s3994_s2  }
  0x86   :  { %s3935_s23 = scalar_lea.hbm %s4847_s18, 2048 }
  0x87   :  { %p3936_p0 = scmp.ne.s32.totalorder %s4847_s18, %s3935_s23  ;;  %p3939_p1 = scmp.lt.u32.totalorder %s3935_s23, %s4847_s18 }
  0x89   :  { %p3941_p2 = pnand %p3939_p1, %p3936_p0 }
  0x8b   :  { %3944 = shalt.err (!%p3941_p2)
}
  0x8c   :  { %s3945_s27 = scalar_lea.vmem %s4230_s24, 2048  ;;  %p3950_p4 = scmp.lt.s32.totalorder %s4230_s24, %s4230_s24 }
  0x8d   :  { %p3946_p3 = scmp.ne.s32.totalorder %s4230_s24, %s3945_s27  ;;  %p3951_p5 = scmp.lt.s32.totalorder %s3945_s27, %s3945_s27 }
  0x8f   :  { %p3952_p6 = por %p3951_p5, %p3950_p4 }
  0x91   :  { %p3953_p7 = pnand %p3952_p6, %p3946_p3 }
  0x93   :  { %3956 = shalt.err (!%p3953_p7)
}
  0x94   :  { %150 = dma.hbm_to_vmem [thread:$0]  %s4847_s18, 2048, %s4230_s24, [#allocation15], %s3993_s26, %s3993_s26, %s3994_s2  }
  0x95   :  { %3979 = dma.done.wait [#allocation3], 2048  }
  0x96   :  { %3980 = vsyncadd [#allocation3], 4294965248 }
  0x97   :  { %3981 = dma.done.wait [#allocation6], 4096  }
  0x98   :  { %3982 = vsyncadd [#allocation6], 4294963200 }
  0x99   :  { %3983 = dma.done.wait [#allocation9], 10240  }
  0x9a   :  { %3984 = vsyncadd [#allocation9], 4294957056 }
  0x9b   :  { %3985 = dma.done.wait [#allocation12], 4096  }
  0x9c   :  { %3986 = vsyncadd [#allocation12], 4294963200 }
  0x9d   :  { %3987 = dma.done.wait [#allocation15], 2048  }
  0x9e   :  { %3988 = vsyncadd [#allocation15], 4294965248  ;;  %v4003_v0 = vmov 0.0|0.0   ;;  %vm4004_vm0 = vmmov 0   ;;  %v4005_v1 = vmov 0.0   ;;  %s4862_s2 = sld [smem:[#allocation24_spill]] }
  0x9f   :  { %3163 = vmatprep.subr.bf16.mxu0 %v4003_v0  ;;  %2530 = vmatprep.mubr.msk.f32.mxu0 %vm4004_vm0, %v4005_v1  ;;  %v182_v10 = vld [vmem:[#allocation13] sm:$0xff]  ;;  %v183_v11 = vld [vmem:[#allocation13 + $0x8] sm:$0xff]  ;;  %v184_v12 = vld [vmem:[#allocation13 + $0x10] sm:$0xff]  ;;  %s4863_s11 = sld [smem:[#allocation23_spill]]  ;;  %s4864_s5 = sld [smem:[#allocation25_spill]]  ;;  %vm2143_vm1 = vcmask 254976  }
  0xa0   :  { %3187 = vmatprep.subr.bf16.mxu1 %v4003_v0  ;;  %2565 = vmatprep.mubr.msk.f32.mxu1 %vm4004_vm0, %v4005_v1  ;;  %v185_v13 = vld [vmem:[#allocation13 + $0x18] sm:$0xff]  ;;  %v4292_v15 = vpack.c.bf16 %v183_v11, %v182_v10  ;;  %v186_v19 = vld [vmem:[#allocation13 + $0x20] sm:$0xff]  ;;  %v187_v20 = vld [vmem:[#allocation13 + $0x28] sm:$0xff]  ;;  %s4865_s27 = sld [smem:[#allocation26_spill]]  ;;  %s4866_s18 = sld [smem:[#allocation27_spill]] }
  0xa1   :  { %v4302_v18 = vpack.c.bf16 %v185_v13, %v184_v12  ;;  %v4313_v24 = vpack.c.bf16 %v187_v20, %v186_v19  ;;  %v188_v25 = vld [vmem:[#allocation13 + $0x30] sm:$0xff]  ;;  %v189_v26 = vld [vmem:[#allocation13 + $0x38] sm:$0xff]  ;;  %v190_v31 = vld [vmem:[#allocation13 + $0x40] sm:$0xff]  ;;  %s4867_s6 = sld [smem:[#allocation29_spill]] }
  0xa2   :  { %3189 = vmatpush3.bf16.msra.mxu1 %v4292_v15  ;;  %v4324_v30 = vpack.c.bf16 %v189_v26, %v188_v25  ;;  %v191_v32 = vld [vmem:[#allocation13 + $0x48] sm:$0xff]  ;;  %v192_v37 = vld [vmem:[#allocation13 + $0x50] sm:$0xff]  ;;  %v193_v38 = vld [vmem:[#allocation13 + $0x58] sm:$0xff] }
  0xa3   :  { %3190 = vmatprep.subr.bf16.mxu1 %v4003_v0  ;;  %v4335_v36 = vpack.c.bf16 %v191_v32, %v190_v31  ;;  %v4346_v42 = vpack.c.bf16 %v193_v38, %v192_v37  ;;  %v194_v43 = vld [vmem:[#allocation13 + $0x60] sm:$0xff]  ;;  %v195_v44 = vld [vmem:[#allocation13 + $0x68] sm:$0xff]  ;;  %v196_v48 = vld [vmem:[#allocation13 + $0x70] sm:$0xff] }
  0xa4   :  { %v198_v2 = vld [vmem:[%s4862_s2] sm:$0xff]  ;;  %v199_v3 = vld [vmem:[%s4862_s2 + $0x8] sm:$0xff]  ;;  %v200_v4 = vld [vmem:[%s4862_s2 + $0x10] sm:$0xff]  ;;  %v4351_v46 = vpack.c.bf16 %v195_v44, %v194_v43 }
  0xa5   :  { %v3164_v5 = vpack.c.bf16 %v199_v3, %v198_v2  ;;  %v201_v6 = vld [vmem:[%s4862_s2 + $0x18] sm:$0xff]  ;;  %v202_v8 = vld [vmem:[%s4862_s2 + $0x20] sm:$0xff]  ;;  %v203_v9 = vld [vmem:[%s4862_s2 + $0x28] sm:$0xff] }
  0xa6   :  { %v3167_v7 = vpack.c.bf16 %v201_v6, %v200_v4  ;;  %v3170_v14 = vpack.c.bf16 %v203_v9, %v202_v8  ;;  %v204_v16 = vld [vmem:[%s4862_s2 + $0x30] sm:$0xff]  ;;  %v205_v17 = vld [vmem:[%s4862_s2 + $0x38] sm:$0xff]  ;;  %v206_v22 = vld [vmem:[%s4862_s2 + $0x40] sm:$0xff]  ;;  %3192 = vmatpush3.bf16.msra.mxu1 %v4302_v18 }
  0xa7   :  { %3165 = vmatpush3.bf16.msra.mxu0 %v3164_v5  ;;  %v3173_v21 = vpack.c.bf16 %v205_v17, %v204_v16  ;;  %v207_v23 = vld [vmem:[%s4862_s2 + $0x48] sm:$0xff]  ;;  %3193 = vmatprep.subr.bf16.mxu1 %v4003_v0  ;;  %v208_v28 = vld [vmem:[%s4862_s2 + $0x50] sm:$0xff]  ;;  %v209_v29 = vld [vmem:[%s4862_s2 + $0x58] sm:$0xff] }
  0xa8   :  { %3166 = vmatprep.subr.bf16.mxu0 %v4003_v0  ;;  %v3176_v27 = vpack.c.bf16 %v207_v23, %v206_v22  ;;  %v3179_v33 = vpack.c.bf16 %v209_v29, %v208_v28  ;;  %v210_v34 = vld [vmem:[%s4862_s2 + $0x60] sm:$0xff]  ;;  %v211_v35 = vld [vmem:[%s4862_s2 + $0x68] sm:$0xff]  ;;  %v212_v40 = vld [vmem:[%s4862_s2 + $0x70] sm:$0xff] }
  0xa9   :  { %v3182_v39 = vpack.c.bf16 %v211_v35, %v210_v34  ;;  %v213_v41 = vld [vmem:[%s4862_s2 + $0x78] sm:$0xff]  ;;  %v181_v47 = vld [vmem:[%s4863_s11] sm:$0x3]  ;;  %v453_v57 = vld [vmem:[#allocation2 + $0x8] sm:$0xff] }
  0xaa   :  { %3195 = vmatpush3.bf16.msra.mxu1 %v4313_v24  ;;  %v3185_v45 = vpack.c.bf16 %v213_v41, %v212_v40  ;;  %v197_v49 = vld [vmem:[#allocation13 + $0x78] sm:$0xff]  ;;  %v2164_v51 = vld [vmem:[%s4864_s5] ss:$0 sm:$0xff]  ;;  %v454_v58 = vld [vmem:[#allocation2 + $0x10] sm:$0xff] }
  0xab   :  { %3168 = vmatpush3.bf16.msra.mxu0 %v3167_v7  ;;  %3196 = vmatprep.subr.bf16.mxu1 %v4003_v0  ;;  %v4376_v50 = vpack.c.bf16 %v197_v49, %v196_v48  ;;  %v452_v56 = vld [vmem:[#allocation2] sm:$0xff]  ;;  %v455_v60 = vld [vmem:[#allocation2 + $0x18] sm:$0xff]  ;;  %v457_v63 = vld [vmem:[#allocation2 + $0x28] sm:$0xff] }
  0xac   :  { %3169 = vmatprep.subr.bf16.mxu0 %v4003_v0  ;;  %v3236_v59 = vpack.c.bf16 %v453_v57, %v452_v56  ;;  %v3239_v61 = vpack.c.bf16 %v455_v60, %v454_v58  ;;  %v456_v62 = vld [vmem:[#allocation2 + $0x20] sm:$0xff]  ;;  %v458_v7 = vld [vmem:[#allocation2 + $0x30] sm:$0xff]  ;;  %v459_v8 = vld [vmem:[#allocation2 + $0x38] sm:$0xff] }
  0xad   :  { %v3242_v2 = vpack.c.bf16 %v457_v63, %v456_v62  ;;  %v3245_v9 = vpack.c.bf16 %v459_v8, %v458_v7  ;;  %v460_v10 = vld [vmem:[#allocation2 + $0x40] sm:$0xff]  ;;  %v461_v11 = vld [vmem:[#allocation2 + $0x48] sm:$0xff]  ;;  %v462_v13 = vld [vmem:[#allocation2 + $0x50] sm:$0xff] }
  0xae   :  { %3198 = vmatpush3.bf16.msra.mxu1 %v4324_v30  ;;  %v3248_v12 = vpack.c.bf16 %v461_v11, %v460_v10  ;;  %v464_v17 = vld [vmem:[#allocation2 + $0x60] sm:$0xff]  ;;  %v465_v19 = vld [vmem:[#allocation2 + $0x68] sm:$0xff]  ;;  %v467_v22 = vld [vmem:[#allocation2 + $0x78] sm:$0xff] }
  0xaf   :  { %3171 = vmatpush3.bf16.msra.mxu0 %v3170_v14  ;;  %3199 = vmatprep.subr.bf16.mxu1 %v4003_v0  ;;  %v463_v14 = vld [vmem:[#allocation2 + $0x58] sm:$0xff]  ;;  %v3254_v20 = vpack.c.bf16 %v465_v19, %v464_v17  ;;  %v4416_v29 = vld [vmem:[%s4865_s27] ss:$0 sm:$0xff]  ;;  %v693_v43 = vld [vmem:[#allocation5 + $0x8] sm:$0xff] }
  0xb0   :  { %3172 = vmatprep.subr.bf16.mxu0 %v4003_v0  ;;  %v3251_v16 = vpack.c.bf16 %v463_v14, %v462_v13  ;;  %v4421_v32 = vld [vmem:[%s4866_s18] ss:$0 sm:$0xff]  ;;  %v787_v60 = vld [vmem:[#allocation7 + $0x10] sm:$0xff]  ;;  %v792_v8 = vld [vmem:[#allocation7 + $0x38] sm:$0xff] }
  0xb1   :  { %v2167_v35 = vld [vmem:[%s4867_s6] ss:$0 sm:$0xff]  ;;  %v791_v7 = vld [vmem:[#allocation7 + $0x30] sm:$0xff]  ;;  %v701_v11 = vld [vmem:[#allocation5 + $0x48] sm:$0xff] }
  0xb2   :  { %3201 = vmatpush3.bf16.msra.mxu1 %v4335_v36  ;;  %v692_v41 = vld [vmem:[#allocation5] sm:$0xff]  ;;  %v794_v14 = vld [vmem:[#allocation7 + $0x48] sm:$0xff]  ;;  %v702_v17 = vld [vmem:[#allocation5 + $0x50] sm:$0xff] }
  0xb3   :  { %3174 = vmatpush3.bf16.msra.mxu0 %v3173_v21  ;;  %3202 = vmatprep.subr.bf16.mxu1 %v4003_v0  ;;  %v466_v21 = vld [vmem:[#allocation2 + $0x70] sm:$0xff]  ;;  %v3308_v44 = vpack.c.bf16 %v693_v43, %v692_v41  ;;  %v696_v49 = vld [vmem:[#allocation5 + $0x20] sm:$0xff]  ;;  %v703_v19 = vld [vmem:[#allocation5 + $0x58] sm:$0xff] }
  0xb4   :  { %3175 = vmatprep.subr.bf16.mxu0 %v4003_v0  ;;  %v3257_v23 = vpack.c.bf16 %v467_v22, %v466_v21  ;;  %v789_v63 = vld [vmem:[#allocation7 + $0x20] sm:$0xff]  ;;  %v3323_v21 = vpack.c.bf16 %v703_v19, %v702_v17  ;;  %v796_v22 = vld [vmem:[#allocation7 + $0x58] sm:$0xff]  ;;  %v972_v41 = vld [vmem:[#allocation10 + $0x8] sm:$0xff] }
  0xb5   :  { %v700_v10 = vld [vmem:[#allocation5 + $0x40] sm:$0xff]  ;;  %v976_v43 = vld [vmem:[#allocation10 + $0x28] sm:$0xff]  ;;  %v885_v17 = vld [vmem:[#allocation8 + $0x38] sm:$0xff] }
  0xb6   :  { %3204 = vmatpush3.bf16.msra.mxu1 %v4346_v42  ;;  %v793_v13 = vld [vmem:[#allocation7 + $0x40] sm:$0xff] }
  0xb7   :  { %3177 = vmatpush3.bf16.msra.mxu0 %v3176_v27  ;;  %3205 = vmatprep.subr.bf16.mxu1 %v4003_v0 }
  0xb8   :  { %3178 = vmatprep.subr.bf16.mxu0 %v4003_v0 }
  0xba   :  { %3207 = vmatpush3.bf16.msra.mxu1 %v4351_v46 }
  0xbb   :  { %3180 = vmatpush3.bf16.msra.mxu0 %v3179_v33  ;;  %3208 = vmatprep.subr.bf16.mxu1 %v4003_v0 }
  0xbc   :  { %3181 = vmatprep.subr.bf16.mxu0 %v4003_v0 }
  0xbe   :  { %3210 = vmatpush3.bf16.msra.mxu1 %v4376_v50 }
  0xbf   :  { %3183 = vmatpush3.bf16.msra.mxu0 %v3182_v39  ;;  %3235 = vmatprep.subr.bf16.mxu1 %v4003_v0 }
  0xc0   :  { %3184 = vmatprep.subr.bf16.mxu0 %v4003_v0 }
  0xc3   :  { %3186 = vmatpush3.bf16.msra.mxu0 %v3185_v45  ;;  %v694_v45 = vld [vmem:[#allocation5 + $0x10] sm:$0xff] }
  0xc4   :  { %3211 = vmatprep.subr.bf16.mxu0 %v4003_v0 }
  0xc6   :  { %2531 = vmatmul.mubr.f32.vlgmr.msra.gmra.mrb[0].mxu0 %v181_v47 }
  0xc7   :  { %3213 = vmatpush3.bf16.msra.mxu0 %v4292_v15  ;;  %2600 = vmatprep.mubr.msk.f32.mxu0 %vm4004_vm0, %v4005_v1 }
  0xc8   :  { %3214 = vmatprep.subr.bf16.mxu0 %v4003_v0 }
  0xcb   :  { %3216 = vmatpush3.bf16.msra.mxu0 %v4302_v18 }
  0xcc   :  { %3217 = vmatprep.subr.bf16.mxu0 %v4003_v0 }
  0xcf   :  { %3219 = vmatpush3.bf16.msra.mxu0 %v4313_v24 }
  0xd0   :  { %3220 = vmatprep.subr.bf16.mxu0 %v4003_v0 }
  0xd3   :  { %3222 = vmatpush3.bf16.msra.mxu0 %v4324_v30 }
  0xd4   :  { %3223 = vmatprep.subr.bf16.mxu0 %v4003_v0 }
  0xd7   :  { %3225 = vmatpush3.bf16.msra.mxu0 %v4335_v36 }
  0xd8   :  { %3226 = vmatprep.subr.bf16.mxu0 %v4003_v0 }
  0xdb   :  { %3228 = vmatpush3.bf16.msra.mxu0 %v4346_v42 }
  0xdc   :  { %3229 = vmatprep.subr.bf16.mxu0 %v4003_v0 }
  0xdf   :  { %3231 = vmatpush3.bf16.msra.mxu0 %v4351_v46 }
  0xe0   :  { %3232 = vmatprep.subr.bf16.mxu0 %v4003_v0 }
  0xe3   :  { %3234 = vmatpush3.bf16.msra.mxu0 %v4376_v50 }
  0xe4   :  { %3259 = vmatprep.subr.bf16.mxu0 %v4003_v0 }
 0x199   :  { %v287_v52 = vpop.f32.mrb[0].mxu0 }
 0x19a   :  { %v288_v53 = vadd.f32 %v2164_v51, %v287_v52  ;;  %v2532_v54 = vpop.f32.mrb[1].mxu0  ;;  %v697_v51 = vld [vmem:[#allocation5 + $0x28] sm:$0xff] }
 0x19b   :  { %v3314_v52 = vpack.c.bf16 %v697_v51, %v696_v49  ;;  %v786_v54 = vld [vmem:[#allocation7 + $0x8] sm:$0xff] }
 0x19c   :  { %v291_v55 = vadd.f32 %v288_v53, %v181_v47  ;;  %v695_v47 = vld [vmem:[#allocation5 + $0x18] sm:$0xff]  ;;  %v785_v53 = vld [vmem:[#allocation7] sm:$0xff] }
 0x19d   :  { %v3311_v48 = vpack.c.bf16 %v695_v47, %v694_v45  ;;  %v3332_v58 = vpack.c.bf16 %v786_v54, %v785_v53  ;;  %v879_v53 = vld [vmem:[#allocation8 + $0x8] sm:$0xff]  ;;  %v971_v54 = vld [vmem:[#allocation10] sm:$0xff] }
 0x19e   :  { %2566 = vmatmul.mubr.f32.vlgmr.msra.gmra.mrb[0].mxu1 %v291_v55 }
 0x19f   :  { %2635 = vmatprep.mubr.msk.f32.mxu1 %vm4004_vm0, %v4005_v1  ;;  %3237 = vmatpush3.bf16.msra.mxu1 %v3236_v59 }
 0x1a0   :  { %3238 = vmatprep.subr.bf16.mxu1 %v4003_v0 }
 0x1a3   :  { %3240 = vmatpush3.bf16.msra.mxu1 %v3239_v61  ;;  %v788_v61 = vld [vmem:[#allocation7 + $0x18] sm:$0xff] }
 0x1a4   :  { %3241 = vmatprep.subr.bf16.mxu1 %v4003_v0  ;;  %v3335_v62 = vpack.c.bf16 %v788_v61, %v787_v60 }
 0x1a7   :  { %3243 = vmatpush3.bf16.msra.mxu1 %v3242_v2  ;;  %v790_v2 = vld [vmem:[#allocation7 + $0x28] sm:$0xff] }
 0x1a8   :  { %3244 = vmatprep.subr.bf16.mxu1 %v4003_v0 }
 0x1ab   :  { %3246 = vmatpush3.bf16.msra.mxu1 %v3245_v9  ;;  %v3341_v9 = vpack.c.bf16 %v792_v8, %v791_v7  ;;  %v883_v7 = vld [vmem:[#allocation8 + $0x28] sm:$0xff] }
 0x1ac   :  { %3247 = vmatprep.subr.bf16.mxu1 %v4003_v0 }
 0x1af   :  { %3249 = vmatpush3.bf16.msra.mxu1 %v3248_v12  ;;  %v3320_v12 = vpack.c.bf16 %v701_v11, %v700_v10  ;;  %v987_v10 = vld [vmem:[#allocation10 + $0x80] sm:$0xff] }
 0x1b0   :  { %3250 = vmatprep.subr.bf16.mxu1 %v4003_v0  ;;  %v991_v11 = vld [vmem:[#allocation10 + $0xa0] sm:$0xff] }
 0x1b1   :  { %v4495_v19 = vpack.c.bf16 %v991_v11, %v987_v10  ;;  %v1031_v10 = vld [vmem:[#allocation10 + $0x1e0] sm:$0xff] }
 0x1b3   :  { %3252 = vmatpush3.bf16.msra.mxu1 %v3251_v16  ;;  %v3344_v16 = vpack.c.bf16 %v794_v14, %v793_v13  ;;  %v1000_v13 = vld [vmem:[#allocation10 + $0xe8] sm:$0xff] }
 0x1b4   :  { %3253 = vmatprep.subr.bf16.mxu1 %v4003_v0 }
 0x1b7   :  { %3255 = vmatpush3.bf16.msra.mxu1 %v3254_v20  ;;  %v795_v20 = vld [vmem:[#allocation7 + $0x50] sm:$0xff] }
 0x1b8   :  { %3256 = vmatprep.subr.bf16.mxu1 %v4003_v0 }
 0x1bb   :  { %3258 = vmatpush3.bf16.msra.mxu1 %v3257_v23  ;;  %v3347_v23 = vpack.c.bf16 %v796_v22, %v795_v20  ;;  %v999_v22 = vld [vmem:[#allocation10 + $0xe0] sm:$0xff] }
 0x1bc   :  { %3283 = vmatprep.subr.bf16.mxu1 %v4003_v0 }
 0x271   :  { %v360_v3 = vpop.f32.mrb[0].mxu1 }
 0x272   :  { %v364_v4 = vsub.f32 %v291_v55, %v360_v3  ;;  %v2567_v5 = vpop.f32.mrb[1].mxu1  ;;  %v3338_v3 = vpack.c.bf16 %v790_v2, %v789_v63  ;;  %v881_v63 = vld [vmem:[#allocation8 + $0x18] sm:$0xff] }
 0x273   :  { %v699_v5 = vld [vmem:[#allocation5 + $0x38] sm:$0xff] }
 0x274   :  { %v365_v6 = vmul.f32 %v364_v4, %v364_v4 }
 0x276   :  { %2601 = vmatmul.mubr.f32.vlgmr.msra.gmra.mrb[2].mxu0 %v365_v6 }
 0x277   :  { %3261 = vmatpush3.bf16.msra.mxu0 %v4292_v15  ;;  %2670 = vmatprep.mubr.msk.f32.mxu0 %vm4004_vm0, %v4005_v1 }
 0x278   :  { %3262 = vmatprep.subr.bf16.mxu0 %v4003_v0 }
 0x27b   :  { %3264 = vmatpush3.bf16.msra.mxu0 %v4302_v18 }
 0x27c   :  { %3265 = vmatprep.subr.bf16.mxu0 %v4003_v0 }
 0x27f   :  { %3267 = vmatpush3.bf16.msra.mxu0 %v4313_v24 }
 0x280   :  { %3268 = vmatprep.subr.bf16.mxu0 %v4003_v0 }
 0x283   :  { %3270 = vmatpush3.bf16.msra.mxu0 %v4324_v30 }
 0x284   :  { %3271 = vmatprep.subr.bf16.mxu0 %v4003_v0 }
 0x287   :  { %3273 = vmatpush3.bf16.msra.mxu0 %v4335_v36 }
 0x288   :  { %3274 = vmatprep.subr.bf16.mxu0 %v4003_v0 }
 0x28b   :  { %3276 = vmatpush3.bf16.msra.mxu0 %v4346_v42 }
 0x28c   :  { %3277 = vmatprep.subr.bf16.mxu0 %v4003_v0 }
 0x28f   :  { %3279 = vmatpush3.bf16.msra.mxu0 %v4351_v46 }
 0x290   :  { %3280 = vmatprep.subr.bf16.mxu0 %v4003_v0 }
 0x293   :  { %3282 = vmatpush3.bf16.msra.mxu0 %v4376_v50 }
 0x294   :  { %3307 = vmatprep.subr.bf16.mxu0 %v4003_v0 }
 0x349   :  { %v432_v25 = vpop.f32.mrb[2].mxu0 }
 0x34a   :  { %v433_v26 = vadd.f32 1e-05, %v432_v25  ;;  %v2602_v27 = vpop.f32.mrb[3].mxu0  ;;  %v704_v25 = vld [vmem:[#allocation5 + $0x60] sm:$0xff] }
 0x34b   :  { %v797_v27 = vld [vmem:[#allocation7 + $0x60] sm:$0xff] }
 0x34c   :  { %3763 = vrsqrt.f32 %v433_v26  ;;  %v705_v26 = vld [vmem:[#allocation5 + $0x68] sm:$0xff] }
 0x356   :  { %v3764_v28 = vpop.eup %3763 }
 0x357   :  { %v437_v31 = vmul.f32 %v3764_v28, %v364_v4  ;;  %v698_v4 = vld [vmem:[#allocation5 + $0x30] sm:$0xff]  ;;  %v798_v28 = vld [vmem:[#allocation7 + $0x68] sm:$0xff] }
 0x358   :  { %v3317_v6 = vpack.c.bf16 %v699_v5, %v698_v4  ;;  %v979_v4 = vld [vmem:[#allocation10 + $0x40] sm:$0xff]  ;;  %v988_v5 = vld [vmem:[#allocation10 + $0x88] sm:$0xff] }
 0x359   :  { %v444_v33 = vmul.f32 %v4416_v29, %v437_v31  ;;  %v3326_v31 = vpack.c.bf16 %v705_v26, %v704_v25  ;;  %v1008_v25 = vld [vmem:[#allocation10 + $0x128] sm:$0xff] }
 0x35b   :  { %v451_v34 = vadd.f32 %v4421_v32, %v444_v33  ;;  %v3350_v33 = vpack.c.bf16 %v798_v28, %v797_v27  ;;  %v886_v27 = vld [vmem:[#allocation8 + $0x40] sm:$0xff]  ;;  %v887_v28 = vld [vmem:[#allocation8 + $0x48] sm:$0xff] }
 0x35d   :  { %2636 = vmatmul.mubr.f32.vlgmr.msra.gmra.mrb[2].mxu1 %v451_v34 }
 0x35e   :  { %3285 = vmatpush3.bf16.msra.mxu1 %v4292_v15  ;;  %2705 = vmatprep.mubr.msk.f32.mxu1 %vm4004_vm0, %v4005_v1 }
 0x35f   :  { %3286 = vmatprep.subr.bf16.mxu1 %v4003_v0 }
 0x362   :  { %3288 = vmatpush3.bf16.msra.mxu1 %v4302_v18 }
 0x363   :  { %3289 = vmatprep.subr.bf16.mxu1 %v4003_v0 }
 0x366   :  { %3291 = vmatpush3.bf16.msra.mxu1 %v4313_v24 }
 0x367   :  { %3292 = vmatprep.subr.bf16.mxu1 %v4003_v0 }
 0x36a   :  { %3294 = vmatpush3.bf16.msra.mxu1 %v4324_v30 }
 0x36b   :  { %3295 = vmatprep.subr.bf16.mxu1 %v4003_v0 }
 0x36e   :  { %3297 = vmatpush3.bf16.msra.mxu1 %v4335_v36 }
 0x36f   :  { %3298 = vmatprep.subr.bf16.mxu1 %v4003_v0 }
 0x372   :  { %3300 = vmatpush3.bf16.msra.mxu1 %v4346_v42 }
 0x373   :  { %3301 = vmatprep.subr.bf16.mxu1 %v4003_v0 }
 0x376   :  { %3303 = vmatpush3.bf16.msra.mxu1 %v4351_v46 }
 0x377   :  { %3304 = vmatprep.subr.bf16.mxu1 %v4003_v0 }
 0x37a   :  { %3306 = vmatpush3.bf16.msra.mxu1 %v4376_v50 }
 0x37b   :  { %3331 = vmatprep.subr.bf16.mxu1 %v4003_v0 }
 0x430   :  { %v541_v37 = vpop.f32.mrb[2].mxu1 }
 0x431   :  { %v542_v38 = vadd.f32 %v2167_v35, %v541_v37  ;;  %v2637_v39 = vpop.f32.mrb[3].mxu1  ;;  %v707_v35 = vld [vmem:[#allocation5 + $0x78] sm:$0xff]  ;;  %v799_v37 = vld [vmem:[#allocation7 + $0x70] sm:$0xff] }
 0x433   :  { %v545_v40 = vadd.f32 %v542_v38, %v451_v34  ;;  %v706_v34 = vld [vmem:[#allocation5 + $0x70] sm:$0xff]  ;;  %v800_v38 = vld [vmem:[#allocation7 + $0x78] sm:$0xff] }
 0x434   :  { %v3329_v39 = vpack.c.bf16 %v707_v35, %v706_v34  ;;  %v1003_v34 = vld [vmem:[#allocation10 + $0x100] sm:$0xff] }
 0x435   :  { %2671 = vmatmul.mubr.f32.vlgmr.msra.gmra.mrb[4].mxu0 %v545_v40  ;;  %v1007_v35 = vld [vmem:[#allocation10 + $0x120] sm:$0xff] }
 0x436   :  { %2740 = vmatprep.mubr.msk.f32.mxu0 %vm4004_vm0, %v4005_v1  ;;  %3309 = vmatpush3.bf16.msra.mxu0 %v3308_v44  ;;  %v4469_v44 = vpack.c.bf16 %v976_v43, %v972_v41  ;;  %v889_v41 = vld [vmem:[#allocation8 + $0x58] sm:$0xff]  ;;  %v4509_v43 = vpack.c.bf16 %v1007_v35, %v1003_v34 }
 0x437   :  { %3310 = vmatprep.subr.bf16.mxu0 %v4003_v0 }
 0x43a   :  { %3312 = vmatpush3.bf16.msra.mxu0 %v3311_v48 }
 0x43b   :  { %3313 = vmatprep.subr.bf16.mxu0 %v4003_v0 }
 0x43e   :  { %3315 = vmatpush3.bf16.msra.mxu0 %v3314_v52  ;;  %v878_v52 = vld [vmem:[#allocation8] sm:$0xff] }
 0x43f   :  { %3316 = vmatprep.subr.bf16.mxu0 %v4003_v0  ;;  %v3356_v60 = vpack.c.bf16 %v879_v53, %v878_v52  ;;  %v890_v53 = vld [vmem:[#allocation8 + $0x60] sm:$0xff] }
 0x442   :  { %3318 = vmatpush3.bf16.msra.mxu0 %v3317_v6 }
 0x443   :  { %3319 = vmatprep.subr.bf16.mxu0 %v4003_v0 }
 0x446   :  { %3321 = vmatpush3.bf16.msra.mxu0 %v3320_v12  ;;  %v996_v12 = vld [vmem:[#allocation10 + $0xc8] sm:$0xff] }
 0x447   :  { %3322 = vmatprep.subr.bf16.mxu0 %v4003_v0  ;;  %v4498_v20 = vpack.c.bf16 %v1000_v13, %v996_v12  ;;  %v973_v13 = vld [vmem:[#allocation10 + $0x10] sm:$0xff] }
 0x44a   :  { %3324 = vmatpush3.bf16.msra.mxu0 %v3323_v21  ;;  %v995_v21 = vld [vmem:[#allocation10 + $0xc0] sm:$0xff] }
 0x44b   :  { %3325 = vmatprep.subr.bf16.mxu0 %v4003_v0 }
 0x44e   :  { %3327 = vmatpush3.bf16.msra.mxu0 %v3326_v31  ;;  %v4502_v31 = vpack.c.bf16 %v999_v22, %v995_v21  ;;  %v986_v21 = vld [vmem:[#allocation10 + $0x78] sm:$0xff] }
 0x44f   :  { %3328 = vmatprep.subr.bf16.mxu0 %v4003_v0 }
 0x452   :  { %3330 = vmatpush3.bf16.msra.mxu0 %v3329_v39  ;;  %v3368_v39 = vpack.c.bf16 %v887_v28, %v886_v27  ;;  %v990_v27 = vld [vmem:[#allocation10 + $0x98] sm:$0xff] }
 0x453   :  { %3355 = vmatprep.subr.bf16.mxu0 %v4003_v0  ;;  %v994_v28 = vld [vmem:[#allocation10 + $0xb8] sm:$0xff] }
 0x454   :  { %v4548_v35 = vpack.c.bf16 %v994_v28, %v990_v27  ;;  %v1033_v27 = vld [vmem:[#allocation10 + $0x1f0] sm:$0xff] }
 0x508   :  { %v612_v55 = vpop.f32.mrb[4].mxu0 }
 0x509   :  { %v4451_v56 = vsub.f32 %v545_v40, %v612_v55  ;;  %v2672_v57 = vpop.f32.mrb[5].mxu0  ;;  %v3353_v40 = vpack.c.bf16 %v800_v38, %v799_v37  ;;  %v975_v55 = vld [vmem:[#allocation10 + $0x20] sm:$0xff]  ;;  %v1012_v37 = vld [vmem:[#allocation10 + $0x148] sm:$0xff] }
 0x50a   :  { %v4477_v2 = vpack.c.bf16 %v975_v55, %v971_v54  ;;  %v1016_v38 = vld [vmem:[#allocation10 + $0x168] sm:$0xff] }
 0x50b   :  { %v617_v59 = vmul.f32 %v4451_v56, %v4451_v56  ;;  %v891_v54 = vld [vmem:[#allocation8 + $0x68] sm:$0xff] }
 0x50d   :  { %2706 = vmatmul.mubr.f32.vlgmr.msra.gmra.mrb[4].mxu1 %v617_v59  ;;  %v984_v59 = vld [vmem:[#allocation10 + $0x68] sm:$0xff] }
 0x50e   :  { %3333 = vmatpush3.bf16.msra.mxu1 %v3332_v58  ;;  %2775 = vmatprep.mubr.msk.f32.mxu1 %vm4004_vm0, %v4005_v1  ;;  %v980_v58 = vld [vmem:[#allocation10 + $0x48] sm:$0xff] }
 0x50f   :  { %3334 = vmatprep.subr.bf16.mxu1 %v4003_v0 }
 0x512   :  { %3336 = vmatpush3.bf16.msra.mxu1 %v3335_v62  ;;  %v880_v62 = vld [vmem:[#allocation8 + $0x10] sm:$0xff] }
 0x513   :  { %3337 = vmatprep.subr.bf16.mxu1 %v4003_v0  ;;  %v3359_v6 = vpack.c.bf16 %v881_v63, %v880_v62  ;;  %v1032_v62 = vld [vmem:[#allocation10 + $0x1e8] sm:$0xff]  ;;  %v3374_v63 = vpack.c.bf16 %v891_v54, %v890_v53  ;;  %v1005_v54 = vld [vmem:[#allocation10 + $0x110] sm:$0xff] }
 0x516   :  { %3339 = vmatpush3.bf16.msra.mxu1 %v3338_v3  ;;  %v4479_v3 = vpack.c.bf16 %v984_v59, %v980_v58  ;;  %v1019_v58 = vld [vmem:[#allocation10 + $0x180] sm:$0xff] }
 0x517   :  { %3340 = vmatprep.subr.bf16.mxu1 %v4003_v0  ;;  %v1023_v59 = vld [vmem:[#allocation10 + $0x1a0] sm:$0xff] }
 0x51a   :  { %3342 = vmatpush3.bf16.msra.mxu1 %v3341_v9 }
 0x51b   :  { %3343 = vmatprep.subr.bf16.mxu1 %v4003_v0 }
 0x51e   :  { %3345 = vmatpush3.bf16.msra.mxu1 %v3344_v16  ;;  %v884_v16 = vld [vmem:[#allocation8 + $0x30] sm:$0xff] }
 0x51f   :  { %3346 = vmatprep.subr.bf16.mxu1 %v4003_v0  ;;  %v3365_v26 = vpack.c.bf16 %v885_v17, %v884_v16  ;;  %v982_v17 = vld [vmem:[#allocation10 + $0x58] sm:$0xff] }
 0x522   :  { %3348 = vmatpush3.bf16.msra.mxu1 %v3347_v23  ;;  %v1004_v23 = vld [vmem:[#allocation10 + $0x108] sm:$0xff] }
 0x523   :  { %3349 = vmatprep.subr.bf16.mxu1 %v4003_v0 }
 0x526   :  { %3351 = vmatpush3.bf16.msra.mxu1 %v3350_v33  ;;  %v4505_v33 = vpack.c.bf16 %v1008_v25, %v1004_v23  ;;  %v4538_v23 = vpack.c.bf16 %v986_v21, %v982_v17  ;;  %v981_v25 = vld [vmem:[#allocation10 + $0x50] sm:$0xff]  ;;  %v1034_v17 = vld [vmem:[#allocation10 + $0x1f8] sm:$0xff] }
 0x527   :  { %3352 = vmatprep.subr.bf16.mxu1 %v4003_v0 }
 0x52a   :  { %3354 = vmatpush3.bf16.msra.mxu1 %v3353_v40  ;;  %v888_v40 = vld [vmem:[#allocation8 + $0x50] sm:$0xff] }
 0x52b   :  { %3380 = vmatprep.subr.bf16.mxu1 %v4469_v44  ;;  %v3371_v52 = vpack.c.bf16 %v889_v41, %v888_v40  ;;  %v1002_v40 = vld [vmem:[#allocation10 + $0xf8] sm:$0xff] }
 0x5e0   :  { %v684_v45 = vpop.f32.mrb[4].mxu1 }
 0x5e1   :  { %v685_v47 = vadd.f32 1e-05, %v684_v45  ;;  %v2707_v48 = vpop.f32.mrb[5].mxu1  ;;  %v4512_v45 = vpack.c.bf16 %v1016_v38, %v1012_v37  ;;  %v989_v37 = vld [vmem:[#allocation10 + $0x90] sm:$0xff] }
 0x5e2   :  { %v1015_v48 = vld [vmem:[#allocation10 + $0x160] sm:$0xff]  ;;  %v993_v38 = vld [vmem:[#allocation10 + $0xb0] sm:$0xff] }
 0x5e3   :  { %3765 = vrsqrt.f32 %v685_v47  ;;  %v1011_v47 = vld [vmem:[#allocation10 + $0x140] sm:$0xff]  ;;  %v3421_v41 = vpack.c.bf16 %v993_v38, %v989_v37 }
 0x5e4   :  { %v4516_v55 = vpack.c.bf16 %v1015_v48, %v1011_v47  ;;  %v997_v47 = vld [vmem:[#allocation10 + $0xd0] sm:$0xff]  ;;  %v2169_v37 = vld [vmem:[%s4839_s10] ss:$0 sm:$0xff] }
 0x5e5   :  { %v1001_v48 = vld [vmem:[#allocation10 + $0xf0] sm:$0xff] }
 0x5ed   :  { %v3766_v49 = vpop.eup %3765 }
 0x5ee   :  { %v689_v51 = vmul.f32 %v3766_v49, %v4451_v56  ;;  %v983_v56 = vld [vmem:[#allocation10 + $0x60] sm:$0xff]  ;;  %v1020_v49 = vld [vmem:[#allocation10 + $0x188] sm:$0xff] }
 0x5ef   :  { %v4487_v8 = vpack.c.bf16 %v983_v56, %v979_v4  ;;  %v892_v4 = vld [vmem:[#allocation8 + $0x70] sm:$0xff]  ;;  %v893_v56 = vld [vmem:[#allocation8 + $0x78] sm:$0xff] }
 0x5f0   :  { %v690_v57 = vmul.f32 %v4416_v29, %v689_v51  ;;  %v992_v29 = vld [vmem:[#allocation10 + $0xa8] sm:$0xff]  ;;  %v3377_v11 = vpack.c.bf16 %v893_v56, %v892_v4  ;;  %v1013_v4 = vld [vmem:[#allocation10 + $0x150] sm:$0xff] }
 0x5f1   :  { %v4490_v9 = vpack.c.bf16 %v992_v29, %v988_v5  ;;  %v1024_v51 = vld [vmem:[#allocation10 + $0x1a8] sm:$0xff]  ;;  %v974_v5 = vld [vmem:[#allocation10 + $0x18] sm:$0xff]  ;;  %v4523_v29 = vpack.c.bf16 %v1023_v59, %v1019_v58  ;;  %v1009_v58 = vld [vmem:[#allocation10 + $0x130] sm:$0xff] }
 0x5f2   :  { %v4475_v61 = vadd.f32 %v4421_v32, %v690_v57  ;;  %v882_v32 = vld [vmem:[#allocation8 + $0x20] sm:$0xff]  ;;  %v4519_v57 = vpack.c.bf16 %v1024_v51, %v1020_v49  ;;  %v1006_v49 = vld [vmem:[#allocation10 + $0x118] sm:$0xff]  ;;  %v1017_v56 = vld [vmem:[#allocation10 + $0x170] sm:$0xff] }
 0x5f3   :  { %v3362_v14 = vpack.c.bf16 %v883_v7, %v882_v32  ;;  %v1027_v7 = vld [vmem:[#allocation10 + $0x1c0] sm:$0xff]  ;;  %v1010_v51 = vld [vmem:[#allocation10 + $0x138] sm:$0xff] }
 0x5f4   :  { %2741 = vmatmul.mubr.f32.vlgmr.msra.gmra.mrb[6].mxu0 %v4475_v61  ;;  %2776 = vmatmul.mubr.f32.vlgmr.msra.gmra.mrb[6].mxu1 %v4475_v61  ;;  %v4532_v16 = vpack.c.bf16 %v1031_v10, %v1027_v7  ;;  %v3427_v53 = vpack.c.bf16 %v1010_v51, %v1006_v49  ;;  %v1014_v59 = vld [vmem:[#allocation10 + $0x158] sm:$0xff]  ;;  %v3433_v7 = vpack.c.bf16 %v1017_v56, %v1013_v4  ;;  %v1331_v49 = vld [vmem:[#allocation11 + $0x60] sm:$0xff]  ;;  %v1332_v51 = vld [vmem:[#allocation11 + $0x68] sm:$0xff] }
 0x5f5   :  { %3357 = vmatpush3.bf16.msra.mxu0 %v3356_v60  ;;  %2810 = vmatprep.mubr.msk.f32.mxu0 %vm4004_vm0, %v4005_v1  ;;  %v1028_v60 = vld [vmem:[#allocation10 + $0x1c8] sm:$0xff] }
 0x5f6   :  { %3358 = vmatprep.subr.bf16.mxu0 %v4003_v0  ;;  %3382 = vmatpush1.bf16.msra.mxu1 %v4477_v2  ;;  %v4526_v32 = vpack.c.bf16 %v1032_v62, %v1028_v60  ;;  %v1018_v60 = vld [vmem:[#allocation10 + $0x178] sm:$0xff]  ;;  %v3429_v62 = vpack.c.bf16 %v1009_v58, %v1005_v54 }
 0x5f7   :  { %3384 = vmatprep.subr.bf16.mxu1 %v4479_v3  ;;  %1099 = vmatprep.mubr.f32.mxu1 %v4005_v1  ;;  %v1334_v54 = vld [vmem:[#allocation11 + $0x78] sm:$0xff] }
 0x5f9   :  { %3360 = vmatpush3.bf16.msra.mxu0 %v3359_v6  ;;  %v978_v6 = vld [vmem:[#allocation10 + $0x38] sm:$0xff] }
 0x5fa   :  { %3361 = vmatprep.subr.bf16.mxu0 %v4003_v0  ;;  %3386 = vmatpush1.bf16.msra.mxu1 %v4487_v8  ;;  %v4529_v12 = vpack.c.bf16 %v978_v6, %v974_v5  ;;  %v1022_v5 = vld [vmem:[#allocation10 + $0x198] sm:$0xff] }
 0x5fb   :  { %3388 = vmatprep.subr.bf16.mxu1 %v4490_v9  ;;  %v1026_v6 = vld [vmem:[#allocation10 + $0x1b8] sm:$0xff] }
 0x5fc   :  { %v3435_v10 = vpack.c.bf16 %v1026_v6, %v1022_v5 }
 0x5fd   :  { %3363 = vmatpush3.bf16.msra.mxu0 %v3362_v14  ;;  %v977_v14 = vld [vmem:[#allocation10 + $0x30] sm:$0xff] }
 0x5fe   :  { %3364 = vmatprep.subr.bf16.mxu0 %v4003_v0  ;;  %3390 = vmatpush1.bf16.msra.mxu1 %v4495_v19  ;;  %v4535_v22 = vpack.c.bf16 %v977_v14, %v973_v13  ;;  %v1025_v13 = vld [vmem:[#allocation10 + $0x1b0] sm:$0xff]  ;;  %v1030_v14 = vld [vmem:[#allocation10 + $0x1d8] sm:$0xff] }
 0x5ff   :  { %3392 = vmatprep.subr.bf16.mxu1 %v4498_v20 }
 0x601   :  { %3366 = vmatpush3.bf16.msra.mxu0 %v3365_v26  ;;  %v985_v26 = vld [vmem:[#allocation10 + $0x70] sm:$0xff] }
 0x602   :  { %3367 = vmatprep.subr.bf16.mxu0 %v4003_v0  ;;  %3394 = vmatpush1.bf16.msra.mxu1 %v4502_v31  ;;  %v4544_v34 = vpack.c.bf16 %v985_v26, %v981_v25  ;;  %v3439_v25 = vpack.c.bf16 %v1034_v17, %v1030_v14  ;;  %v1029_v26 = vld [vmem:[#allocation10 + $0x1d0] sm:$0xff] }
 0x603   :  { %3396 = vmatprep.subr.bf16.mxu1 %v4505_v33  ;;  %v3441_v28 = vpack.c.bf16 %v1033_v27, %v1029_v26 }
 0x605   :  { %3369 = vmatpush3.bf16.msra.mxu0 %v3368_v39  ;;  %v998_v39 = vld [vmem:[#allocation10 + $0xd8] sm:$0xff] }
 0x606   :  { %3370 = vmatprep.subr.bf16.mxu0 %v4003_v0  ;;  %3398 = vmatpush1.bf16.msra.mxu1 %v4509_v43 }
 0x607   :  { %3400 = vmatprep.subr.bf16.mxu1 %v4512_v45 }
 0x609   :  { %3372 = vmatpush3.bf16.msra.mxu0 %v3371_v52  ;;  %v3425_v52 = vpack.c.bf16 %v1001_v48, %v997_v47 }
 0x60a   :  { %3373 = vmatprep.subr.bf16.mxu0 %v4003_v0  ;;  %3402 = vmatpush1.bf16.msra.mxu1 %v4516_v55 }
 0x60b   :  { %3404 = vmatprep.subr.bf16.mxu1 %v4519_v57 }
 0x60d   :  { %3375 = vmatpush3.bf16.msra.mxu0 %v3374_v63  ;;  %v3431_v63 = vpack.c.bf16 %v1018_v60, %v1014_v59  ;;  %v2168_v59 = vld [vmem:[%s4837_s8] ss:$0 sm:$0xff] }
 0x60e   :  { %3376 = vmatprep.subr.bf16.mxu0 %v4003_v0  ;;  %3406 = vmatpush1.bf16.msra.mxu1 %v4523_v29 }
 0x60f   :  { %3408 = vmatprep.subr.bf16.mxu1 %v4526_v32 }
 0x611   :  { %3378 = vmatpush3.bf16.msra.mxu0 %v3377_v11  ;;  %v1021_v11 = vld [vmem:[#allocation10 + $0x190] sm:$0xff] }
 0x612   :  { %3412 = vmatprep.subr.bf16.mxu0 %v4529_v12  ;;  %3410 = vmatpush1.bf16.msra.mxu1 %v4532_v16  ;;  %v3437_v21 = vpack.c.bf16 %v1025_v13, %v1021_v11 }
 0x613   :  { %3444 = vmatprep.subr.bf16.mxu1 %v4469_v44  ;;  %v3423_v44 = vpack.c.bf16 %v1002_v40, %v998_v39 }
 0x614   :  { %2811 = vmatmul.mubr.f32.vlgmr.msra.gmra.mrb[8].mxu0 %v4475_v61 }
 0x615   :  { %3414 = vmatpush1.bf16.msra.mxu0 %v4535_v22  ;;  %1170 = vmatprep.mubr.f32.mxu0 %v4005_v1 }
 0x616   :  { %3416 = vmatprep.subr.bf16.mxu0 %v4538_v23 }
 0x619   :  { %3418 = vmatpush1.bf16.msra.mxu0 %v4544_v34 }
 0x61a   :  { %3420 = vmatprep.subr.bf16.mxu0 %v4548_v35 }
 0x61d   :  { %3422 = vmatpush1.bf16.msra.mxu0 %v3421_v41 }
 0x61e   :  { %3424 = vmatprep.subr.bf16.mxu0 %v3423_v44 }
 0x621   :  { %3426 = vmatpush1.bf16.msra.mxu0 %v3425_v52 }
 0x622   :  { %3428 = vmatprep.subr.bf16.mxu0 %v3427_v53 }
 0x625   :  { %3430 = vmatpush1.bf16.msra.mxu0 %v3429_v62 }
 0x626   :  { %3432 = vmatprep.subr.bf16.mxu0 %v3431_v63 }
 0x629   :  { %3434 = vmatpush1.bf16.msra.mxu0 %v3433_v7 }
 0x62a   :  { %3436 = vmatprep.subr.bf16.mxu0 %v3435_v10 }
 0x62d   :  { %3438 = vmatpush1.bf16.msra.mxu0 %v3437_v21 }
 0x62e   :  { %3440 = vmatprep.subr.bf16.mxu0 %v3439_v25 }
 0x631   :  { %3442 = vmatpush1.bf16.msra.mxu0 %v3441_v28 }
 0x632   :  { %3476 = vmatprep.subr.bf16.mxu0 %v4529_v12  ;;  %v1326_v12 = vld [vmem:[#allocation11 + $0x38] sm:$0xff] }
 0x6c7   :  { %v4556_v38 = vpop.f32.mrb[6].mxu0  ;;  %v874_v39 = vpop.f32.mrb[6].mxu1 }
 0x6c8   :  { %v875_v40 = vadd.f32 %v2169_v37, %v874_v39  ;;  %v2742_v47 = vpop.f32.mrb[7].mxu0  ;;  %v2777_v48 = vpop.f32.mrb[7].mxu1  ;;  %v782_v60 = vadd.f32 %v2168_v59, %v4556_v38  ;;  %v1810_v59 = vld [vmem:[#allocation14] sm:$0xff] }
 0x6ca   :  { %1100 = vmatmul.mubr.f32.vlgmr.msra.gmra.mrb[8].mxu1 %v875_v40  ;;  %1171 = vmatmul.mubr.f32.vlgmr.msra.gmra.mrb[10].mxu0 %v875_v40 }
 0x6cb   :  { %3446 = vmatpush1.bf16.msra.mxu1 %v4477_v2  ;;  %3478 = vmatpush1.bf16.msra.mxu0 %v4535_v22  ;;  %v1319_v2 = vld [vmem:[#allocation11] sm:$0xff] }
 0x6cc   :  { %3448 = vmatprep.subr.bf16.mxu1 %v4479_v3  ;;  %3480 = vmatprep.subr.bf16.mxu0 %v4538_v23  ;;  %v1320_v3 = vld [vmem:[#allocation11 + $0x8] sm:$0xff]  ;;  %v1327_v22 = vld [vmem:[#allocation11 + $0x40] sm:$0xff] }
 0x6cd   :  { %1241 = vmatprep.mubr.f32.mxu1 %v4005_v1  ;;  %1312 = vmatprep.mubr.f32.mxu0 %v4005_v1  ;;  %v1328_v23 = vld [vmem:[#allocation11 + $0x48] sm:$0xff] }
 0x6cf   :  { %3450 = vmatpush1.bf16.msra.mxu1 %v4487_v8  ;;  %3482 = vmatpush1.bf16.msra.mxu0 %v4544_v34  ;;  %v2170_v8 = vld [vmem:[%s4841_s12] ss:$0 sm:$0xff]  ;;  %v3520_v34 = vpack.c.bf16 %v1328_v23, %v1327_v22 }
 0x6d0   :  { %3452 = vmatprep.subr.bf16.mxu1 %v4490_v9  ;;  %3484 = vmatprep.subr.bf16.mxu0 %v4548_v35  ;;  %v1329_v35 = vld [vmem:[#allocation11 + $0x50] sm:$0xff] }
 0x6d3   :  { %3454 = vmatpush1.bf16.msra.mxu1 %v4495_v19  ;;  %3486 = vmatpush1.bf16.msra.mxu0 %v3421_v41  ;;  %v4582_v19 = vpack.c.bf16 %v1320_v3, %v1319_v2  ;;  %v1330_v41 = vld [vmem:[#allocation11 + $0x58] sm:$0xff] }
 0x6d4   :  { %3456 = vmatprep.subr.bf16.mxu1 %v4498_v20  ;;  %3488 = vmatprep.subr.bf16.mxu0 %v3423_v44  ;;  %v3523_v44 = vpack.c.bf16 %v1330_v41, %v1329_v35 }
 0x6d7   :  { %3458 = vmatpush1.bf16.msra.mxu1 %v4502_v31  ;;  %3490 = vmatpush1.bf16.msra.mxu0 %v3425_v52  ;;  %v3526_v52 = vpack.c.bf16 %v1332_v51, %v1331_v49 }
 0x6d8   :  { %3460 = vmatprep.subr.bf16.mxu1 %v4505_v33  ;;  %3492 = vmatprep.subr.bf16.mxu0 %v3427_v53  ;;  %v1321_v33 = vld [vmem:[#allocation11 + $0x10] sm:$0xff] }
 0x6d9   :  { %v1333_v53 = vld [vmem:[#allocation11 + $0x70] sm:$0xff] }
 0x6da   :  { %v3529_v58 = vpack.c.bf16 %v1334_v54, %v1333_v53 }
 0x6db   :  { %3462 = vmatpush1.bf16.msra.mxu1 %v4509_v43  ;;  %3494 = vmatpush1.bf16.msra.mxu0 %v3429_v62  ;;  %v1322_v43 = vld [vmem:[#allocation11 + $0x18] sm:$0xff] }
 0x6dc   :  { %3464 = vmatprep.subr.bf16.mxu1 %v4512_v45  ;;  %3496 = vmatprep.subr.bf16.mxu0 %v3431_v63  ;;  %v4588_v45 = vpack.c.bf16 %v1322_v43, %v1321_v33 }
 0x6df   :  { %3466 = vmatpush1.bf16.msra.mxu1 %v4516_v55  ;;  %3498 = vmatpush1.bf16.msra.mxu0 %v3433_v7  ;;  %v1323_v55 = vld [vmem:[#allocation11 + $0x20] sm:$0xff] }
 0x6e0   :  { %3468 = vmatprep.subr.bf16.mxu1 %v4519_v57  ;;  %3500 = vmatprep.subr.bf16.mxu0 %v3435_v10  ;;  %v1324_v57 = vld [vmem:[#allocation11 + $0x28] sm:$0xff] }
 0x6e3   :  { %3470 = vmatpush1.bf16.msra.mxu1 %v4523_v29  ;;  %3502 = vmatpush1.bf16.msra.mxu0 %v3437_v21  ;;  %v4598_v29 = vpack.c.bf16 %v1324_v57, %v1323_v55 }
 0x6e4   :  { %3472 = vmatprep.subr.bf16.mxu1 %v4526_v32  ;;  %3504 = vmatprep.subr.bf16.mxu0 %v3439_v25  ;;  %v1325_v32 = vld [vmem:[#allocation11 + $0x30] sm:$0xff] }
 0x6e7   :  { %v967_v9 = vpop.f32.mrb[8].mxu0  ;;  %3474 = vmatpush1.bf16.msra.mxu1 %v4532_v16  ;;  %3506 = vmatpush1.bf16.msra.mxu0 %v3441_v28  ;;  %v3517_v16 = vpack.c.bf16 %v1326_v12, %v1325_v32 }
 0x6e8   :  { %v968_v20 = vadd.f32 %v2170_v8, %v967_v9  ;;  %v2812_v31 = vpop.f32.mrb[9].mxu0  ;;  %3507 = vmatprep.subr.bf16.mxu1 %v4003_v0  ;;  %3531 = vmatprep.subr.bf16.mxu0 %v4003_v0 }
 0x6ea   :  { %1242 = vmatmul.mubr.f32.vlgmr.msra.gmra.mrb[10].mxu1 %v968_v20  ;;  %1313 = vmatmul.mubr.f32.vlgmr.msra.gmra.mrb[12].mxu0 %v968_v20 }
 0x6eb   :  { %3509 = vmatpush3.bf16.msra.mxu1 %v4582_v19  ;;  %3533 = vmatpush3.bf16.msra.mxu0 %v4582_v19 }
 0x6ec   :  { %3510 = vmatprep.subr.bf16.mxu1 %v4003_v0  ;;  %3534 = vmatprep.subr.bf16.mxu0 %v4003_v0 }
 0x6ed   :  { %2845 = vmatprep.mubr.msk.f32.mxu1 %vm4004_vm0, %v4005_v1  ;;  %2880 = vmatprep.mubr.msk.f32.mxu0 %vm4004_vm0, %v4005_v1 }
 0x6ef   :  { %3512 = vmatpush3.bf16.msra.mxu1 %v4588_v45  ;;  %3536 = vmatpush3.bf16.msra.mxu0 %v4588_v45 }
 0x6f0   :  { %3513 = vmatprep.subr.bf16.mxu1 %v4003_v0  ;;  %3537 = vmatprep.subr.bf16.mxu0 %v4003_v0 }
 0x6f3   :  { %3515 = vmatpush3.bf16.msra.mxu1 %v4598_v29  ;;  %3539 = vmatpush3.bf16.msra.mxu0 %v4598_v29 }
 0x6f4   :  { %3516 = vmatprep.subr.bf16.mxu1 %v4003_v0  ;;  %3540 = vmatprep.subr.bf16.mxu0 %v4003_v0 }
 0x6f7   :  { %3518 = vmatpush3.bf16.msra.mxu1 %v3517_v16  ;;  %3542 = vmatpush3.bf16.msra.mxu0 %v3517_v16 }
 0x6f8   :  { %3519 = vmatprep.subr.bf16.mxu1 %v4003_v0  ;;  %3543 = vmatprep.subr.bf16.mxu0 %v4003_v0 }
 0x6fb   :  { %3521 = vmatpush3.bf16.msra.mxu1 %v3520_v34  ;;  %3545 = vmatpush3.bf16.msra.mxu0 %v3520_v34 }
 0x6fc   :  { %3522 = vmatprep.subr.bf16.mxu1 %v4003_v0  ;;  %3546 = vmatprep.subr.bf16.mxu0 %v4003_v0 }
 0x6ff   :  { %3524 = vmatpush3.bf16.msra.mxu1 %v3523_v44  ;;  %3548 = vmatpush3.bf16.msra.mxu0 %v3523_v44 }
 0x700   :  { %3525 = vmatprep.subr.bf16.mxu1 %v4003_v0  ;;  %3549 = vmatprep.subr.bf16.mxu0 %v4003_v0 }
 0x703   :  { %3527 = vmatpush3.bf16.msra.mxu1 %v3526_v52  ;;  %3551 = vmatpush3.bf16.msra.mxu0 %v3526_v52 }
 0x704   :  { %3528 = vmatprep.subr.bf16.mxu1 %v4003_v0  ;;  %3552 = vmatprep.subr.bf16.mxu0 %v4003_v0 }
 0x707   :  { %3530 = vmatpush3.bf16.msra.mxu1 %v3529_v58  ;;  %3554 = vmatpush3.bf16.msra.mxu0 %v3529_v58 }
 0x708   :  { %3555 = vmatprep.subr.bf16.mxu1 %v4003_v0  ;;  %3579 = vmatprep.subr.bf16.mxu0 %v4003_v0 }
 0x79d   :  { %v1101_v62 = vpop.f32.mrb[8].mxu1  ;;  %v1172_v63 = vpop.f32.mrb[10].mxu0 }
 0x79e   :  { %v1335_v4 = vmul.f32 %v1101_v62, %v782_v60  ;;  %v1477_v56 = vmul.f32 %v1172_v63, %v782_v60  ;;  %v1103_v5 = vpop.f32.mrb[9].mxu1  ;;  %v1174_v6 = vpop.f32.mrb[11].mxu0  ;;  %v1812_v62 = vld [vmem:[#allocation14 + $0x10] sm:$0xff] }
 0x79f   :  { %v1406_v7 = vmul.f32 %v1103_v5, %v782_v60  ;;  %v1548_v10 = vmul.f32 %v1174_v6, %v782_v60  ;;  %v1811_v60 = vld [vmem:[#allocation14 + $0x8] sm:$0xff]  ;;  %v1814_v5 = vld [vmem:[#allocation14 + $0x20] sm:$0xff] }
 0x7a0   :  { %2846 = vmatmul.mubr.f32.vlgmr.msra.gmra.mrb[12].mxu1 %v1335_v4  ;;  %v3652_v63 = vpack.c.bf16 %v1811_v60, %v1810_v59  ;;  %v1813_v4 = vld [vmem:[#allocation14 + $0x18] sm:$0xff]  ;;  %v1815_v6 = vld [vmem:[#allocation14 + $0x28] sm:$0xff]  ;;  %v2062_v60 = vld [vmem:[%s4849_s20 + $0x60] sm:$0xff] }
 0x7a1   :  { %3557 = vmatpush3.bf16.msra.mxu1 %v4582_v19  ;;  %2881 = vmatmul.mubr.f32.vlgmr.msra.gmra.mrb[14].mxu0 %v1406_v7  ;;  %v3658_v7 = vpack.c.bf16 %v1815_v6, %v1814_v5 }
 0x7a2   :  { %3581 = vmatpush3.bf16.msra.mxu0 %v4582_v19  ;;  %3558 = vmatprep.subr.bf16.mxu1 %v4003_v0 }
 0x7a3   :  { %3582 = vmatprep.subr.bf16.mxu0 %v4003_v0  ;;  %2915 = vmatprep.mubr.msk.f32.mxu1 %vm4004_vm0, %v4005_v1 }
 0x7a4   :  { %2950 = vmatprep.mubr.msk.f32.mxu0 %vm4004_vm0, %v4005_v1 }
 0x7a5   :  { %3560 = vmatpush3.bf16.msra.mxu1 %v4588_v45 }
 0x7a6   :  { %3584 = vmatpush3.bf16.msra.mxu0 %v4588_v45  ;;  %3561 = vmatprep.subr.bf16.mxu1 %v4003_v0 }
 0x7a7   :  { %3585 = vmatprep.subr.bf16.mxu0 %v4003_v0 }
 0x7a9   :  { %3563 = vmatpush3.bf16.msra.mxu1 %v4598_v29 }
 0x7aa   :  { %3587 = vmatpush3.bf16.msra.mxu0 %v4598_v29  ;;  %3564 = vmatprep.subr.bf16.mxu1 %v4003_v0 }
 0x7ab   :  { %3588 = vmatprep.subr.bf16.mxu0 %v4003_v0 }
 0x7ad   :  { %3566 = vmatpush3.bf16.msra.mxu1 %v3517_v16 }
 0x7ae   :  { %3590 = vmatpush3.bf16.msra.mxu0 %v3517_v16  ;;  %3567 = vmatprep.subr.bf16.mxu1 %v4003_v0 }
 0x7af   :  { %3591 = vmatprep.subr.bf16.mxu0 %v4003_v0 }
 0x7b1   :  { %3569 = vmatpush3.bf16.msra.mxu1 %v3520_v34 }
 0x7b2   :  { %3593 = vmatpush3.bf16.msra.mxu0 %v3520_v34  ;;  %3570 = vmatprep.subr.bf16.mxu1 %v4003_v0 }
 0x7b3   :  { %3594 = vmatprep.subr.bf16.mxu0 %v4003_v0 }
 0x7b5   :  { %3572 = vmatpush3.bf16.msra.mxu1 %v3523_v44 }
 0x7b6   :  { %3596 = vmatpush3.bf16.msra.mxu0 %v3523_v44  ;;  %3573 = vmatprep.subr.bf16.mxu1 %v4003_v0 }
 0x7b7   :  { %3597 = vmatprep.subr.bf16.mxu0 %v4003_v0 }
 0x7b9   :  { %3575 = vmatpush3.bf16.msra.mxu1 %v3526_v52 }
 0x7ba   :  { %3599 = vmatpush3.bf16.msra.mxu0 %v3526_v52  ;;  %3576 = vmatprep.subr.bf16.mxu1 %v4003_v0 }
 0x7bb   :  { %3600 = vmatprep.subr.bf16.mxu0 %v4003_v0 }
 0x7bd   :  { %v4644_v11 = vpop.f32.mrb[10].mxu1  ;;  %v4646_v13 = vpop.f32.mrb[12].mxu0  ;;  %3578 = vmatpush3.bf16.msra.mxu1 %v3529_v58 }
 0x7be   :  { %v4648_v14 = vpop.f32.mrb[11].mxu1  ;;  %v4650_v17 = vpop.f32.mrb[13].mxu0  ;;  %3602 = vmatpush3.bf16.msra.mxu0 %v3529_v58  ;;  %3603 = vmatprep.subr.bf16.mxu1 %v4003_v0 }
 0x7bf   :  { %3627 = vmatprep.subr.bf16.mxu0 %v4003_v0 }
 0x7c0   :  { %2916 = vmatmul.mubr.f32.vlgmr.msra.gmra.mrb[14].mxu1 %v1477_v56  ;;  %v3655_v56 = vpack.c.bf16 %v1813_v4, %v1812_v62  ;;  %v2063_v62 = vld [vmem:[%s4849_s20 + $0x68] sm:$0xff]  ;;  %v2064_v4 = vld [vmem:[%s4849_s20 + $0x70] sm:$0xff] }
 0x7c1   :  { %2951 = vmatmul.mubr.f32.vlgmr.msra.gmra.mrb[16].mxu0 %v1548_v10  ;;  %3605 = vmatpush3.bf16.msra.mxu1 %v4292_v15 }
 0x7c2   :  { %3606 = vmatprep.subr.bf16.mxu1 %v4003_v0  ;;  %2985 = vmatprep.mubr.msk.f32.mxu1 %vm4004_vm0, %v4005_v1 }
 0x7c3   :  { %3629 = vmatpush3.bf16.msra.mxu0 %v4292_v15  ;;  %3020 = vmatprep.mubr.msk.f32.mxu0 %vm4004_vm0, %v4005_v1 }
 0x7c4   :  { %3630 = vmatprep.subr.bf16.mxu0 %v4003_v0 }
 0x7c5   :  { %3608 = vmatpush3.bf16.msra.mxu1 %v4302_v18 }
 0x7c6   :  { %3609 = vmatprep.subr.bf16.mxu1 %v4003_v0 }
 0x7c7   :  { %3632 = vmatpush3.bf16.msra.mxu0 %v4302_v18 }
 0x7c8   :  { %3633 = vmatprep.subr.bf16.mxu0 %v4003_v0 }
 0x7c9   :  { %3611 = vmatpush3.bf16.msra.mxu1 %v4313_v24 }
 0x7ca   :  { %3612 = vmatprep.subr.bf16.mxu1 %v4003_v0 }
 0x7cb   :  { %3635 = vmatpush3.bf16.msra.mxu0 %v4313_v24 }
 0x7cc   :  { %3636 = vmatprep.subr.bf16.mxu0 %v4003_v0 }
 0x7cd   :  { %3614 = vmatpush3.bf16.msra.mxu1 %v4324_v30 }
 0x7ce   :  { %3615 = vmatprep.subr.bf16.mxu1 %v4003_v0 }
 0x7cf   :  { %3638 = vmatpush3.bf16.msra.mxu0 %v4324_v30 }
 0x7d0   :  { %3639 = vmatprep.subr.bf16.mxu0 %v4003_v0 }
 0x7d1   :  { %3617 = vmatpush3.bf16.msra.mxu1 %v4335_v36 }
 0x7d2   :  { %3618 = vmatprep.subr.bf16.mxu1 %v4003_v0 }
 0x7d3   :  { %3641 = vmatpush3.bf16.msra.mxu0 %v4335_v36 }
 0x7d4   :  { %3642 = vmatprep.subr.bf16.mxu0 %v4003_v0 }
 0x7d5   :  { %3620 = vmatpush3.bf16.msra.mxu1 %v4346_v42 }
 0x7d6   :  { %3621 = vmatprep.subr.bf16.mxu1 %v4003_v0 }
 0x7d7   :  { %3644 = vmatpush3.bf16.msra.mxu0 %v4346_v42 }
 0x7d8   :  { %3645 = vmatprep.subr.bf16.mxu0 %v4003_v0 }
 0x7d9   :  { %3623 = vmatpush3.bf16.msra.mxu1 %v4351_v46 }
 0x7da   :  { %3624 = vmatprep.subr.bf16.mxu1 %v4003_v0 }
 0x7db   :  { %3647 = vmatpush3.bf16.msra.mxu0 %v4351_v46 }
 0x7dc   :  { %3648 = vmatprep.subr.bf16.mxu0 %v4003_v0 }
 0x7dd   :  { %3626 = vmatpush3.bf16.msra.mxu1 %v4376_v50 }
 0x7de   :  { %3651 = vmatprep.subr.bf16.mxu1 %v4003_v0 }
 0x7df   :  { %3650 = vmatpush3.bf16.msra.mxu0 %v4376_v50 }
 0x7e0   :  { %3675 = vmatprep.subr.bf16.mxu0 %v4003_v0 }
 0x873   :  { %v1402_v21 = vpop.f32.mrb[12].mxu1 }
 0x874   :  { %v2847_v25 = vpop.f32.mrb[13].mxu1  ;;  %v1473_v26 = vpop.f32.mrb[14].mxu0 }
 0x875   :  { %v1619_v27 = vmax.f32 %v1402_v21, %v1473_v26  ;;  %v2882_v28 = vpop.f32.mrb[15].mxu0  ;;  %v1818_v25 = vld [vmem:[#allocation14 + $0x40] sm:$0xff] }
 0x876   :  { %v1820_v28 = vld [vmem:[#allocation14 + $0x50] sm:$0xff] }
 0x893   :  { %v1544_v37 = vpop.f32.mrb[14].mxu1 }
 0x894   :  { %v1620_v38 = vmax.f32 %v1619_v27, %v1544_v37  ;;  %v2917_v39 = vpop.f32.mrb[15].mxu1  ;;  %v1615_v40 = vpop.f32.mrb[16].mxu0 }
 0x895   :  { %v2952_v47 = vpop.f32.mrb[17].mxu0  ;;  %v1822_v39 = vld [vmem:[#allocation14 + $0x60] sm:$0xff] }
 0x896   :  { %v1621_v48 = vmax.f32 %v1620_v38, %v1615_v40 }
 0x898   :  { %v1622_v2 = vsub.f32 %v1402_v21, %v1621_v48  ;;  %v1625_v3 = vsub.f32 %v1473_v26, %v1621_v48  ;;  %v1628_v8 = vsub.f32 %v1544_v37, %v1621_v48  ;;  %v1631_v9 = vsub.f32 %v1615_v40, %v1621_v48  ;;  %v1819_v26 = vld [vmem:[#allocation14 + $0x48] sm:$0xff]  ;;  %v1821_v37 = vld [vmem:[#allocation14 + $0x58] sm:$0xff]  ;;  %v1824_v48 = vld [vmem:[#allocation14 + $0x70] sm:$0xff] }
 0x899   :  { %v3664_v27 = vpack.c.bf16 %v1819_v26, %v1818_v25  ;;  %v3667_v38 = vpack.c.bf16 %v1821_v37, %v1820_v28  ;;  %v1823_v40 = vld [vmem:[#allocation14 + $0x68] sm:$0xff] }
 0x89a   :  { %v1623_v19 = vmul.f32 1.442695, %v1622_v2  ;;  %v1626_v20 = vmul.f32 1.442695, %v1625_v3  ;;  %v1629_v31 = vmul.f32 1.442695, %v1628_v8  ;;  %v3670_v47 = vpack.c.bf16 %v1823_v40, %v1822_v39 }
 0x89b   :  { %v1632_v33 = vmul.f32 1.442695, %v1631_v9  ;;  %v1825_v2 = vld [vmem:[#allocation14 + $0x78] sm:$0xff] }
 0x89c   :  { %3767 = vpow2.f32 %v1623_v19  ;;  %v3673_v3 = vpack.c.bf16 %v1825_v2, %v1824_v48 }
 0x89d   :  { %3769 = vpow2.f32 %v1626_v20 }
 0x89e   :  { %3771 = vpow2.f32 %v1629_v31  ;;  %v4726_v31 = vld [vmem:[%s4845_s16] ss:$0 sm:$0xff] }
 0x89f   :  { %3773 = vpow2.f32 %v1632_v33 }
 0x8a6   :  { %v3768_v43 = vpop.eup %3767 }
 0x8a7   :  { %v3770_v45 = vpop.eup %3769 }
 0x8a8   :  { %v1634_v55 = vadd.f32 %v3770_v45, %v3768_v43  ;;  %v3772_v57 = vpop.eup %3771 }
 0x8a9   :  { %v3774_v32 = vpop.eup %3773 }
 0x8aa   :  { %v1635_v29 = vadd.f32 %v3772_v57, %v1634_v55 }
 0x8ac   :  { %v1636_v12 = vadd.f32 %v3774_v32, %v1635_v29  ;;  %v2053_v29 = vld [vmem:[%s4849_s20 + $0x18] sm:$0xff] }
 0x8ae   :  { %3775 = vrcp.f32 %v1636_v12  ;;  %v2055_v12 = vld [vmem:[%s4849_s20 + $0x28] sm:$0xff] }
 0x8b8   :  { %v3776_v16 = vpop.eup %3775 }
 0x8b9   :  { %v1638_v22 = vmul.f32 %v3776_v16, %v3768_v43  ;;  %v1640_v23 = vmul.f32 %v3776_v16, %v3770_v45  ;;  %v1643_v34 = vmul.f32 %v3776_v16, %v3772_v57  ;;  %v1646_v35 = vmul.f32 %v3776_v16, %v3774_v32  ;;  %v4731_v43 = vld [vmem:[%s4846_s17] ss:$0 sm:$0xff] }
 0x8bb   :  { %v1639_v41 = vmul.f32 %v1638_v22, %v4644_v11  ;;  %v1641_v44 = vmul.f32 %v1640_v23, %v4648_v14  ;;  %v1644_v49 = vmul.f32 %v1643_v34, %v4646_v13  ;;  %v1647_v51 = vmul.f32 %v1646_v35, %v4650_v17  ;;  %v1816_v14 = vld [vmem:[#allocation14 + $0x30] sm:$0xff]  ;;  %v1817_v17 = vld [vmem:[#allocation14 + $0x38] sm:$0xff] }
 0x8bc   :  { %v3661_v21 = vpack.c.bf16 %v1817_v17, %v1816_v14  ;;  %v2174_v17 = vld [vmem:[%s4850_s21] ss:$0 sm:$0xff] }
 0x8bd   :  { %v1642_v52 = vadd.f32 %v1641_v44, %v1639_v41  ;;  %v2056_v41 = vld [vmem:[%s4849_s20 + $0x30] sm:$0xff]  ;;  %v2057_v44 = vld [vmem:[%s4849_s20 + $0x38] sm:$0xff] }
 0x8bf   :  { %v1645_v53 = vadd.f32 %v1644_v49, %v1642_v52  ;;  %v3733_v49 = vpack.c.bf16 %v2057_v44, %v2056_v41  ;;  %v2059_v52 = vld [vmem:[%s4849_s20 + $0x48] sm:$0xff] }
 0x8c1   :  { %v1648_v54 = vadd.f32 %v1647_v51, %v1645_v53  ;;  %v2058_v51 = vld [vmem:[%s4849_s20 + $0x40] sm:$0xff] }
 0x8c2   :  { %v3736_v53 = vpack.c.bf16 %v2059_v52, %v2058_v51 }
 0x8c3   :  { %v1649_v58 = vadd.f32 %v1648_v54, %v4475_v61  ;;  %v2060_v54 = vld [vmem:[%s4849_s20 + $0x50] sm:$0xff] }
 0x8c5   :  { %2986 = vmatmul.mubr.f32.vlgmr.msra.gmra.mrb[16].mxu1 %v1649_v58 }
 0x8c6   :  { %3055 = vmatprep.mubr.msk.f32.mxu1 %vm4004_vm0, %v4005_v1  ;;  %3653 = vmatpush3.bf16.msra.mxu1 %v3652_v63  ;;  %v3742_v63 = vpack.c.bf16 %v2063_v62, %v2062_v60 }
 0x8c7   :  { %3654 = vmatprep.subr.bf16.mxu1 %v4003_v0 }
 0x8ca   :  { %3656 = vmatpush3.bf16.msra.mxu1 %v3655_v56  ;;  %v2065_v56 = vld [vmem:[%s4849_s20 + $0x78] sm:$0xff] }
 0x8cb   :  { %3657 = vmatprep.subr.bf16.mxu1 %v4003_v0  ;;  %v3745_v5 = vpack.c.bf16 %v2065_v56, %v2064_v4 }
 0x8ce   :  { %3659 = vmatpush3.bf16.msra.mxu1 %v3658_v7 }
 0x8cf   :  { %3660 = vmatprep.subr.bf16.mxu1 %v4003_v0 }
 0x8d2   :  { %3662 = vmatpush3.bf16.msra.mxu1 %v3661_v21 }
 0x8d3   :  { %3663 = vmatprep.subr.bf16.mxu1 %v4003_v0 }
 0x8d6   :  { %3665 = vmatpush3.bf16.msra.mxu1 %v3664_v27 }
 0x8d7   :  { %3666 = vmatprep.subr.bf16.mxu1 %v4003_v0 }
 0x8da   :  { %3668 = vmatpush3.bf16.msra.mxu1 %v3667_v38 }
 0x8db   :  { %3669 = vmatprep.subr.bf16.mxu1 %v4003_v0 }
 0x8de   :  { %3671 = vmatpush3.bf16.msra.mxu1 %v3670_v47 }
 0x8df   :  { %3672 = vmatprep.subr.bf16.mxu1 %v4003_v0 }
 0x8e2   :  { %3674 = vmatpush3.bf16.msra.mxu1 %v3673_v3 }
 0x8e3   :  { %3699 = vmatprep.subr.bf16.mxu1 %v4003_v0 }
 0x998   :  { %v1718_v61 = vpop.f32.mrb[16].mxu1 }
 0x999   :  { %v1722_v10 = vsub.f32 %v1649_v58, %v1718_v61  ;;  %v2987_v11 = vpop.f32.mrb[17].mxu1  ;;  %v2061_v58 = vld [vmem:[%s4849_s20 + $0x58] sm:$0xff] }
 0x99a   :  { %v3739_v59 = vpack.c.bf16 %v2061_v58, %v2060_v54 }
 0x99b   :  { %v1723_v13 = vmul.f32 %v1722_v10, %v1722_v10 }
 0x99d   :  { %3021 = vmatmul.mubr.f32.vlgmr.msra.gmra.mrb[18].mxu0 %v1723_v13 }
 0x99e   :  { %3677 = vmatpush3.bf16.msra.mxu0 %v4292_v15  ;;  %3090 = vmatprep.mubr.msk.f32.mxu0 %vm4004_vm0, %v4005_v1 }
 0x99f   :  { %3678 = vmatprep.subr.bf16.mxu0 %v4003_v0 }
 0x9a2   :  { %3680 = vmatpush3.bf16.msra.mxu0 %v4302_v18 }
 0x9a3   :  { %3681 = vmatprep.subr.bf16.mxu0 %v4003_v0 }
 0x9a6   :  { %3683 = vmatpush3.bf16.msra.mxu0 %v4313_v24 }
 0x9a7   :  { %3684 = vmatprep.subr.bf16.mxu0 %v4003_v0 }
 0x9aa   :  { %3686 = vmatpush3.bf16.msra.mxu0 %v4324_v30 }
 0x9ab   :  { %3687 = vmatprep.subr.bf16.mxu0 %v4003_v0 }
 0x9ae   :  { %3689 = vmatpush3.bf16.msra.mxu0 %v4335_v36 }
 0x9af   :  { %3690 = vmatprep.subr.bf16.mxu0 %v4003_v0 }
 0x9b2   :  { %3692 = vmatpush3.bf16.msra.mxu0 %v4346_v42 }
 0x9b3   :  { %3693 = vmatprep.subr.bf16.mxu0 %v4003_v0 }
 0x9b6   :  { %3695 = vmatpush3.bf16.msra.mxu0 %v4351_v46 }
 0x9b7   :  { %3696 = vmatprep.subr.bf16.mxu0 %v4003_v0 }
 0x9ba   :  { %3698 = vmatpush3.bf16.msra.mxu0 %v4376_v50 }
 0x9bb   :  { %3723 = vmatprep.subr.bf16.mxu0 %v4003_v0 }
 0xa70   :  { %v1790_v8 = vpop.f32.mrb[18].mxu0 }
 0xa71   :  { %v1791_v9 = vadd.f32 1e-05, %v1790_v8  ;;  %v3022_v19 = vpop.f32.mrb[19].mxu0 }
 0xa73   :  { %3777 = vrsqrt.f32 %v1791_v9 }
 0xa7d   :  { %v3778_v20 = vpop.eup %3777 }
 0xa7e   :  { %v1795_v33 = vmul.f32 %v3778_v20, %v1722_v10 }
 0xa80   :  { %v1802_v45 = vmul.f32 %v4726_v31, %v1795_v33 }
 0xa82   :  { %v1809_v55 = vadd.f32 %v4731_v43, %v1802_v45 }
 0xa84   :  { %3056 = vmatmul.mubr.f32.vlgmr.msra.gmra.mrb[18].mxu1 %v1809_v55 }
 0xa85   :  { %3701 = vmatpush3.bf16.msra.mxu1 %v4292_v15  ;;  %3125 = vmatprep.mubr.msk.f32.mxu1 %vm4004_vm0, %v4005_v1  ;;  %v2173_v15 = vld [vmem:[%s4848_s19] ss:$0 sm:$0xff] }
 0xa86   :  { %3702 = vmatprep.subr.bf16.mxu1 %v4003_v0 }
 0xa89   :  { %3704 = vmatpush3.bf16.msra.mxu1 %v4302_v18 }
 0xa8a   :  { %3705 = vmatprep.subr.bf16.mxu1 %v4003_v0 }
 0xa8d   :  { %3707 = vmatpush3.bf16.msra.mxu1 %v4313_v24 }
 0xa8e   :  { %3708 = vmatprep.subr.bf16.mxu1 %v4003_v0 }
 0xa91   :  { %3710 = vmatpush3.bf16.msra.mxu1 %v4324_v30 }
 0xa92   :  { %3711 = vmatprep.subr.bf16.mxu1 %v4003_v0 }
 0xa95   :  { %3713 = vmatpush3.bf16.msra.mxu1 %v4335_v36 }
 0xa96   :  { %3714 = vmatprep.subr.bf16.mxu1 %v4003_v0 }
 0xa99   :  { %3716 = vmatpush3.bf16.msra.mxu1 %v4346_v42  ;;  %v2050_v42 = vld [vmem:[%s4849_s20] sm:$0xff] }
 0xa9a   :  { %3717 = vmatprep.subr.bf16.mxu1 %v4003_v0 }
 0xa9d   :  { %3719 = vmatpush3.bf16.msra.mxu1 %v4351_v46  ;;  %v2051_v46 = vld [vmem:[%s4849_s20 + $0x8] sm:$0xff] }
 0xa9e   :  { %3720 = vmatprep.subr.bf16.mxu1 %v4003_v0  ;;  %v3724_v57 = vpack.c.bf16 %v2051_v46, %v2050_v42 }
 0xaa1   :  { %3722 = vmatpush3.bf16.msra.mxu1 %v4376_v50  ;;  %v2052_v50 = vld [vmem:[%s4849_s20 + $0x10] sm:$0xff] }
 0xaa2   :  { %v3727_v32 = vpack.c.bf16 %v2053_v29, %v2052_v50 }
 0xb57   :  { %v1899_v18 = vpop.f32.mrb[18].mxu1 }
 0xb58   :  { %v1900_v24 = vadd.f32 %v2173_v15, %v1899_v18  ;;  %v3057_v30 = vpop.f32.mrb[19].mxu1 }
 0xb5a   :  { %v1903_v36 = vadd.f32 %v1900_v24, %v1809_v55 }
 0xb5c   :  { %3091 = vmatmul.mubr.f32.vlgmr.msra.gmra.mrb[20].mxu0 %v1903_v36 }
 0xb5d   :  { %3160 = vmatprep.mubr.msk.f32.mxu0 %vm4004_vm0, %v4005_v1  ;;  %3725 = vmatpush3.bf16.msra.mxu0 %v3724_v57  ;;  %v2054_v1 = vld [vmem:[%s4849_s20 + $0x20] sm:$0xff]  ;;  %s4006_s20 = smov [#allocation16]  }
 0xb5e   :  { %3726 = vmatprep.subr.bf16.mxu0 %v4003_v0  ;;  %v3730_v16 = vpack.c.bf16 %v2055_v12, %v2054_v1  ;;  %s2151_s19 = sshll.u32 %s4006_s20, 4  ;;  %s2152_s19 = int_to_ptr.vmem [resolvable:$true] %s2151_s19 }
 0xb5f   :  { %s3957_s3 = scalar_lea.vmem %s2152_s19, 32  ;;  %p3962_p9 = scmp.lt.s32.totalorder %s2152_s19, %s2152_s19 }
 0xb60   :  { %p3958_p8 = scmp.ne.s32.totalorder %s2152_s19, %s3957_s3  ;;  %p3963_p10 = scmp.lt.s32.totalorder %s3957_s3, %s3957_s3 }
 0xb61   :  { %3728 = vmatpush3.bf16.msra.mxu0 %v3727_v32 }
 0xb62   :  { %3729 = vmatprep.subr.bf16.mxu0 %v4003_v0  ;;  %p3964_p11 = por %p3963_p10, %p3962_p9 }
 0xb64   :  { %p3965_p12 = pnand %p3964_p11, %p3958_p8 }
 0xb65   :  { %3731 = vmatpush3.bf16.msra.mxu0 %v3730_v16 }
 0xb66   :  { %3732 = vmatprep.subr.bf16.mxu0 %v4003_v0 }
 0xb69   :  { %3734 = vmatpush3.bf16.msra.mxu0 %v3733_v49 }
 0xb6a   :  { %3735 = vmatprep.subr.bf16.mxu0 %v4003_v0 }
 0xb6d   :  { %3737 = vmatpush3.bf16.msra.mxu0 %v3736_v53 }
 0xb6e   :  { %3738 = vmatprep.subr.bf16.mxu0 %v4003_v0 }
 0xb71   :  { %3740 = vmatpush3.bf16.msra.mxu0 %v3739_v59 }
 0xb72   :  { %3741 = vmatprep.subr.bf16.mxu0 %v4003_v0 }
 0xb75   :  { %3743 = vmatpush3.bf16.msra.mxu0 %v3742_v63 }
 0xb76   :  { %3744 = vmatprep.subr.bf16.mxu0 %v4003_v0 }
 0xb79   :  { %3746 = vmatpush3.bf16.msra.mxu0 %v3745_v5 }
 0xc2f   :  { %v1970_v22 = vpop.f32.mrb[20].mxu0 }
 0xc30   :  { %v1974_v23 = vsub.f32 %v1903_v36, %v1970_v22  ;;  %v3092_v34 = vpop.f32.mrb[21].mxu0 }
 0xc32   :  { %v1975_v35 = vmul.f32 %v1974_v23, %v1974_v23 }
 0xc34   :  { %3126 = vmatmul.mubr.f32.vlgmr.msra.gmra.mrb[20].mxu1 %v1975_v35 }
 0xd07   :  { %v2042_v6 = vpop.f32.mrb[20].mxu1 }
 0xd08   :  { %v2043_v7 = vadd.f32 1e-05, %v2042_v6  ;;  %v3127_v61 = vpop.f32.mrb[21].mxu1 }
 0xd0a   :  { %3779 = vrsqrt.f32 %v2043_v7 }
 0xd14   :  { %v3780_v10 = vpop.eup %3779 }
 0xd15   :  { %v2047_v11 = vmul.f32 %v3780_v10, %v1974_v23 }
 0xd17   :  { %v2048_v13 = vmul.f32 %v4726_v31, %v2047_v11 }
 0xd19   :  { %v2049_v14 = vadd.f32 %v4731_v43, %v2048_v13 }
 0xd1b   :  { %3161 = vmatmul.mubr.f32.vlgmr.msra.gmra.mrb[22].mxu0 %v2049_v14 }
 0xdee   :  { %v2139_v21 = vpop.f32.mrb[22].mxu0 }
 0xdef   :  { %v2140_v0 = vadd.f32 %v2174_v17, %v2139_v21  ;;  %v3162_v25 = vpop.f32.mrb[23].mxu0 }
 0xdf1   :  { %2144 = vst.msk [vmem:[#allocation16] sm:$0x3] %vm2143_vm1, %v2140_v0 }
 0xdf2   :  { %3968 = shalt.err (!%p3965_p12)
}
 0xdf3   :  { %s3969_s15 = scalar_lea.hbm %s4851_s22, 32 }
 0xdf4   :  { %p3970_p13 = scmp.ne.s32.totalorder %s4851_s22, %s3969_s15  ;;  %p3973_p0 = scmp.lt.u32.totalorder %s3969_s15, %s4851_s22 }
 0xdf6   :  { %p3975_p1 = pnand %p3973_p0, %p3970_p13 }
 0xdf8   :  { %3978 = shalt.err (!%p3975_p1)
}
 0xdf9   :  { %2154 = dma.vmem_to_hbm [thread:$0]  %s2152_s19, 32, %s4851_s22, [#allocation4]  }
 0xdfa   :  { %3989 = dma.done.wait [#allocation4], 32  }
 0xdfb   :  { %3990 = vsyncadd [#allocation4], 4294967264 }
 0xdfc   :  { %2158 = vsyncpa [#allocation3], 1 }
 0xdfd   :  { %2159 = vsyncpa [#allocation6], 1 }
 0xdfe   :  { %2160 = vsyncpa [#allocation9], 1 }
 0xdff   :  { %2161 = vsyncpa [#allocation12], 1 }
 0xe00   :  { %2162 = vsyncpa [#allocation15], 1 }
 0xe01   :  { %2163 = vsyncpa [#allocation4], 1 }

</bundles_post_ra>
